<compile_context>
chip_gen: v5e
topology: v5e:2x2
jax: 0.10.0
libtpu: 0.0.40
codegen_flags: <defaults>
</compile_context>

<pallas_src>
import jax
import jax.numpy as jnp
from jax.experimental import pallas as pl
from jax.experimental.pallas import tpu as pltpu

NUM_HEADS = 8
LN_EPS = 1e-5          # PyTorch layer_norm_eps default
FFN_ROW_CHUNK = 256    # rows per FFN chunk -> bounds the (rows, F) intermediate


# --------------------------------------------------------------------------
# Chip-dependent configuration (computed once at import, all guarded).
# --------------------------------------------------------------------------
def _pick_vmem_limit_bytes():
    """Raise the scoped-VMEM limit toward physical VMEM, with headroom."""
    cap = None
    try:
        cap = int(pltpu.get_tpu_info().vmem_capacity_bytes)
    except Exception:
        cap = None
    if not cap:
        try:
            kind = jax.devices()[0].device_kind.lower()
        except Exception:
            kind = ""
        cap = (64 << 20) if ("v7" in kind or "7x" in kind) else (128 << 20)
    return int(max(min(cap - (8 << 20), 100 << 20), 32 << 20))


def _bf16_softmax_exp_supported():
    """bf16 EUP exists on v6e / v7x; keep softmax exp in f32 on v5e/older."""
    try:
        kind = jax.devices()[0].device_kind.lower()
    except Exception:
        return False
    return any(t in kind for t in ("v6", "v7", "7x"))


def _probe_single_buffered_weights():
    """Check whether pipeline_mode=pl.Buffered(1) lowers for block-invariant
    operands on this jax/libtpu combo; fall back to default buffering if not."""
    try:
        def k(w_ref, x_ref, o_ref):
            o_ref[...] = x_ref[...] + w_ref[...]

        w = jnp.full((8, 128), 2.0, jnp.float32)
        x = jnp.arange(16 * 128, dtype=jnp.float32).reshape(16, 128)
        out = pl.pallas_call(
            k,
            out_shape=jax.ShapeDtypeStruct((16, 128), jnp.float32),
            grid=(2,),
            in_specs=[pl.BlockSpec((8, 128), lambda i: (0, 0),
                                   pipeline_mode=pl.Buffered(1)),
                      pl.BlockSpec((8, 128), lambda i: (i, 0))],
            out_specs=pl.BlockSpec((8, 128), lambda i: (i, 0)),
        )(w, x)
        out = jax.block_until_ready(out)
        return bool(jnp.allclose(out, x + 2.0))
    except Exception:
        return False


_VMEM_LIMIT_BYTES = _pick_vmem_limit_bytes()
_BF16_SOFTMAX_EXP = _bf16_softmax_exp_supported()
_SINGLE_BUFFER_WEIGHTS = _probe_single_buffered_weights()


# --------------------------------------------------------------------------
# Kernel
# --------------------------------------------------------------------------
def _layer_norm(x, gamma, beta):
    """Row-wise LayerNorm in f32. x: (N, E), gamma/beta: (1, E)."""
    mu = jnp.mean(x, axis=-1, keepdims=True)
    xc = x - mu
    var = jnp.mean(xc * xc, axis=-1, keepdims=True)
    return xc * jax.lax.rsqrt(var + LN_EPS) * gamma + beta


def _encoder_layer_kernel(x_ref, wqkv_ref, bqkv_ref, wo_ref, bo_ref,
                          g1_ref, b1n_ref, w1_ref, b1_ref,
                          w2_ref, b2_ref, g2_ref, b2n_ref, o_ref):
    """One nn.TransformerEncoderLayer (post-norm, ReLU, eval) for Bb batch rows.

    x_ref    : (Bb, S, E) f32
    wqkv_ref : (E, 3E) bf16   [Wq|Wk|Wv].T with Wq pre-scaled by 1/sqrt(D)
    bqkv_ref : (1, 3E) f32    (bq pre-scaled)
    wo_ref   : (E, E)  bf16,  bo_ref: (1, E) f32
    g1/b1n, g2/b2n : (1, E) f32 LayerNorm affine params
    w1_ref   : (E, F)  bf16,  b1_ref: (1, F) f32
    w2_ref   : (F, E)  bf16,  b2_ref: (1, E) f32
    o_ref    : (Bb, S, E) f32
    """
    Bb, S, E = x_ref.shape
    H = NUM_HEADS
    D = E // H
    N = Bb * S

    x = x_ref[...].reshape(N, E)                       # f32 residual stream
    xb = x.astype(jnp.bfloat16)

    # ---- fused QKV projection: one wide MXU matmul --------------------------
    qkv = jnp.dot(xb, wqkv_ref[...],
                  preferred_element_type=jnp.float32) + bqkv_ref[...]

    # ---- attention: static per-head lane slices (no head transposes) --------
    # Only one head's (Bb, S, S) scores are live at a time, and each head's
    # context is folded straight into the output projection, so the merged
    # (N, E) context is never materialized.
    wo = wo_ref[...]                                    # (E, E) bf16, load once
    attn = jnp.zeros((N, E), jnp.float32) + bo_ref[...]
    for hd in range(H):
        q0, k0, v0 = hd * D, E + hd * D, 2 * E + hd * D
        qh = qkv[:, q0:q0 + D].astype(jnp.bfloat16).reshape(Bb, S, D)
        kh = qkv[:, k0:k0 + D].astype(jnp.bfloat16).reshape(Bb, S, D)
        vh = qkv[:, v0:v0 + D].astype(jnp.bfloat16).reshape(Bb, S, D)

        s = jnp.einsum('bqd,bkd->bqk', qh, kh,
                       preferred_element_type=jnp.float32)   # (Bb, S, S) f32
        s = s - jnp.max(s, axis=-1, keepdims=True)
        if _BF16_SOFTMAX_EXP:
            p = jnp.exp(s.astype(jnp.bfloat16))               # bf16 EUP (v6e/v7x)
        else:
            p = jnp.exp(s).astype(jnp.bfloat16)               # f32 EUP (v5e)
        denom = jnp.sum(p, axis=-1, keepdims=True, dtype=jnp.float32)

        ctx = jnp.einsum('bqk,bkd->bqd', p, vh,
                         preferred_element_type=jnp.float32)  # (Bb, S, D) f32
        # Fold softmax normalization after p@v (smaller tensor); exact recip.
        ctx = ctx * pl.reciprocal(denom, approx=False)
        ctx = ctx.reshape(N, D).astype(jnp.bfloat16)

        # Per-head contribution to the output projection.
        attn = attn + jnp.dot(ctx, wo[hd * D:(hd + 1) * D, :],
                              preferred_element_type=jnp.float32)

    # ---- residual + LayerNorm 1 ---------------------------------------------
    h1 = _layer_norm(x + attn, g1_ref[...], b1n_ref[...])

    # ---- feed-forward: relu(h @ W1 + b1) @ W2 + b2, row-chunked --------------
    ffn_parts = []
    for r0 in range(0, N, FFN_ROW_CHUNK):
        r1 = min(r0 + FFN_ROW_CHUNK, N)
        hb = h1[r0:r1].astype(jnp.bfloat16)
        f = jnp.dot(hb, w1_ref[...],
                    preferred_element_type=jnp.float32) + b1_ref[...]
        f = jnp.maximum(f, 0.0).astype(jnp.bfloat16)      # bf16 immediately
        ffn_parts.append(jnp.dot(f, w2_ref[...],
                                 preferred_element_type=jnp.float32) + b2_ref[...])
    ffn = ffn_parts[0] if len(ffn_parts) == 1 else jnp.concatenate(ffn_parts, axis=0)

    # ---- residual + LayerNorm 2 ---------------------------------------------
    out = _layer_norm(h1 + ffn, g2_ref[...], b2n_ref[...])
    o_ref[...] = out.reshape(Bb, S, E).astype(o_ref.dtype)


# --------------------------------------------------------------------------
# Wrapper-side plumbing
# --------------------------------------------------------------------------
def _weight_spec(shape):
    """Block-invariant (grid-constant) operand: full array every step.
    Single-buffered when the Buffered(1) pipeline mode is available."""
    n = len(shape)
    idx = lambda b, _n=n: (0,) * _n
    if _SINGLE_BUFFER_WEIGHTS:
        return pl.BlockSpec(shape, idx, pipeline_mode=pl.Buffered(1))
    return pl.BlockSpec(shape, idx)


def _choose_batch_block(B, S, E, F, vmem_budget=8 << 20):
    """Batch rows per grid step, driven by a per-step activation-VMEM model.

    Keep >= 2 grid steps (megacore), prefer >= 4 steps once a step already
    carries >= 256 token rows, and never exceed the activation budget."""
    if B <= 1:
        return 1

    def act_bytes(bb):
        n = bb * S
        by = 0
        by += n * E * (4 + 2)                 # residual stream f32 + bf16 copy
        by += n * 3 * E * 4                   # fused qkv f32
        by += 2 * bb * S * S * (4 + 2)        # ~2 heads of scores/p live
        by += n * E * 4 * 2                   # attn accumulator + post-LN h
        by += min(n, FFN_ROW_CHUNK) * F * (4 + 2)   # row-chunked FFN interm.
        by += n * E * 4                       # output tile
        return by

    best = 1
    for bb in range(1, B):                    # bb == B would leave 1 grid step
        if B % bb:
            continue
        steps = B // bb
        if act_bytes(bb) > vmem_budget:
            continue
        if bb * S >= 256 and steps < 4:
            continue
        best = bb
    return best


def pack_layer_params(layer_params, num_heads=NUM_HEADS):
    """Pre-pack PyTorch-layout per-layer params ONCE (outside the per-call
    path): fused/transposed bf16 QKV with q pre-scaled by 1/sqrt(D),
    transposed bf16 out/ffn weights, f32 row-vector biases / LN params."""
    packed = []
    for (in_w, in_b, out_w, out_b, ln1_w, ln1_b,
         l1_w, l1_b, l2_w, l2_b, ln2_w, ln2_b) in layer_params:
        E = in_w.shape[1]
        F = l1_w.shape[0]
        D = E // num_heads
        scale = 1.0 / jnp.sqrt(jnp.float32(D))
        wqkv = jnp.concatenate(
            [in_w[:E] * scale, in_w[E:2 * E], in_w[2 * E:]], axis=0).T   # (E, 3E)
        bqkv = jnp.concatenate(
            [in_b[:E] * scale, in_b[E:2 * E], in_b[2 * E:]]).reshape(1, 3 * E)
        packed.append((
            wqkv.astype(jnp.bfloat16),                  # (E, 3E)
            bqkv.astype(jnp.float32),                   # (1, 3E)
            out_w.T.astype(jnp.bfloat16),               # (E, E)
            out_b.reshape(1, E).astype(jnp.float32),
            ln1_w.reshape(1, E).astype(jnp.float32),
            ln1_b.reshape(1, E).astype(jnp.float32),
            l1_w.T.astype(jnp.bfloat16),                # (E, F)
            l1_b.reshape(1, F).astype(jnp.float32),
            l2_w.T.astype(jnp.bfloat16),                # (F, E)
            l2_b.reshape(1, E).astype(jnp.float32),
            ln2_w.reshape(1, E).astype(jnp.float32),
            ln2_b.reshape(1, E).astype(jnp.float32),
        ))
    return tuple(packed)


@jax.jit
def transformer_expert(x, packed_layers):
    """Forward pass of TransformerExpert.

    x             : (S, B, E) float32  (PyTorch batch_first=False layout)
    packed_layers : output of pack_layer_params(...)
    returns       : (S, B, E) float32
    """
    S, B, E = x.shape
    F = packed_layers[0][6].shape[1]                     # (E, F) -> F

    h = jnp.transpose(x, (1, 0, 2)).astype(jnp.float32)  # (B, S, E)

    Bb = _choose_batch_block(B, S, E, F)
    grid = (B // Bb,)
    x_spec = pl.BlockSpec((Bb, S, E), lambda b: (b, 0, 0))

    for layer_args in packed_layers:
        in_specs = [x_spec] + [_weight_spec(a.shape) for a in layer_args]
        h = pl.pallas_call(
            _encoder_layer_kernel,
            out_shape=jax.ShapeDtypeStruct((B, S, E), jnp.float32),
            grid=grid,
            in_specs=in_specs,
            out_specs=x_spec,
            compiler_params=pltpu.CompilerParams(
                dimension_semantics=("parallel",),
                vmem_limit_bytes=_VMEM_LIMIT_BYTES),
        )(h, *layer_args)

    return jnp.transpose(h, (1, 0, 2))                    # back to (S, B, E)


# --------------------------------------------------------------------------
# Pure-JAX reference and self-test
# --------------------------------------------------------------------------
def _reference(x, layer_params):
    """Pure-JAX f32 replica of nn.TransformerEncoder (post-norm, ReLU, eval)."""
    H = NUM_HEADS
    S, B, E = x.shape
    D = E // H
    h = jnp.transpose(x, (1, 0, 2)).astype(jnp.float32)   # (B, S, E)

    def ln(t, w, b):
        mu = jnp.mean(t, -1, keepdims=True)
        var = jnp.mean((t - mu) ** 2, -1, keepdims=True)
        return (t - mu) / jnp.sqrt(var + LN_EPS) * w + b

    for (in_w, in_b, out_w, out_b, ln1_w, ln1_b,
         l1_w, l1_b, l2_w, l2_b, ln2_w, ln2_b) in layer_params:
        q = h @ in_w[:E].T + in_b[:E]
        k = h @ in_w[E:2 * E].T + in_b[E:2 * E]
        v = h @ in_w[2 * E:].T + in_b[2 * E:]

        def split(t):
            return t.reshape(B, S, H, D).transpose(0, 2, 1, 3)

        qh, kh, vh = split(q), split(k), split(v)
        sc = jnp.einsum('bhsd,bhtd->bhst', qh, kh) / jnp.sqrt(jnp.float32(D))
        p = jax.nn.softmax(sc, axis=-1)
        ctx = jnp.einsum('bhst,bhtd->bhsd', p, vh)
        ctx = ctx.transpose(0, 2, 1, 3).reshape(B, S, E)
        attn = ctx @ out_w.T + out_b

        h1 = ln(h + attn, ln1_w, ln1_b)
        ff = jnp.maximum(h1 @ l1_w.T + l1_b, 0.0) @ l2_w.T + l2_b
        h = ln(h1 + ff, ln2_w, ln2_b)

    return jnp.transpose(h, (1, 0, 2))


if __name__ == "__main__":
    emb_dim, num_layers, ff_dim = 32, 2, 64     # emb_dim divisible by 8 heads
    seq, batch = 8, 2

    key = jax.random.PRNGKey(0)
    key, kx = jax.random.split(key)
    x = jax.random.normal(kx, (seq, batch, emb_dim), jnp.float32)

    layers = []
    for _ in range(num_layers):
        key, *ks = jax.random.split(key, 13)
        layers.append((
            jax.random.normal(ks[0], (3 * emb_dim, emb_dim), jnp.float32) / jnp.sqrt(emb_dim),
            jax.random.normal(ks[1], (3 * emb_dim,), jnp.float32) * 0.02,
            jax.random.normal(ks[2], (emb_dim, emb_dim), jnp.float32) / jnp.sqrt(emb_dim),
            jax.random.normal(ks[3], (emb_dim,), jnp.float32) * 0.02,
            1.0 + 0.1 * jax.random.normal(ks[4], (emb_dim,), jnp.float32),
            0.02 * jax.random.normal(ks[5], (emb_dim,), jnp.float32),
            jax.random.normal(ks[6], (ff_dim, emb_dim), jnp.float32) / jnp.sqrt(emb_dim),
            jax.random.normal(ks[7], (ff_dim,), jnp.float32) * 0.02,
            jax.random.normal(ks[8], (emb_dim, ff_dim), jnp.float32) / jnp.sqrt(ff_dim),
            jax.random.normal(ks[9], (emb_dim,), jnp.float32) * 0.02,
            1.0 + 0.1 * jax.random.normal(ks[10], (emb_dim,), jnp.float32),
            0.02 * jax.random.normal(ks[11], (emb_dim,), jnp.float32),
        ))
    layers = tuple(layers)

    packed = pack_layer_params(layers)          # pre-pack weights ONCE
    y = transformer_expert(x, packed)
    y = jax.block_until_ready(y)

    y_ref = _reference(x, layers)
    assert y.shape == (seq, batch, emb_dim)

    # bf16 MXU operands (and bf16 softmax exp on v6e/v7x) with f32 accumulation
    # => ~1% deviation from the pure-f32 reference is expected; a structural
    # bug would produce O(1) errors.
    rel_err = float(jnp.linalg.norm(y - y_ref) / jnp.linalg.norm(y_ref))
    max_err = float(jnp.max(jnp.abs(y - y_ref)))
    assert rel_err < 5e-2, f"relative Frobenius error too large: {rel_err:.4f}"
    assert max_err < 3e-1, f"max abs error too large: {max_err:.4f}"

    print("KERNEL_OK")
</pallas_src>

<mosaic_0001>
module attributes {stable_mosaic.version = 11 : i64} {
  func.func @k(%arg0: i32, %arg1: memref<8x128xf32, #tpu.memory_space<vmem>>, %arg2: memref<8x128xf32, #tpu.memory_space<vmem>>, %arg3: memref<8x128xf32, #tpu.memory_space<vmem>>) attributes {dimension_semantics = [#tpu.dimension_semantics<arbitrary>], iteration_bounds = array<i64: 2>, scalar_prefetch = 0 : i64, scratch_operands = 0 : i64, tpu.core_type = #tpu.core_type<tc>, window_params = [{pipeline_mode = #tpu.pipeline_mode<synchronous>, transform_indices = @transform_0, window_bounds = array<i64: 8, 128>}, {transform_indices = @transform_1, window_bounds = array<i64: 8, 128>}, {transform_indices = @transform_2, window_bounds = array<i64: 8, 128>}]} {
    %c0 = arith.constant 0 : index
    %c0_0 = arith.constant 0 : index
    %0 = vector.load %arg2[%c0, %c0_0] : memref<8x128xf32, #tpu.memory_space<vmem>>, vector<8x128xf32>
    %c0_1 = arith.constant 0 : index
    %c0_2 = arith.constant 0 : index
    %1 = vector.load %arg1[%c0_1, %c0_2] : memref<8x128xf32, #tpu.memory_space<vmem>>, vector<8x128xf32>
    %2 = arith.addf %0, %1 : vector<8x128xf32>
    %c0_3 = arith.constant 0 : index
    %c0_4 = arith.constant 0 : index
    %3 = vector.load %arg3[%c0_3, %c0_4] : memref<8x128xf32, #tpu.memory_space<vmem>>, vector<8x128xf32>
    tpu.vector_store %arg3[%c0_3, %c0_4], %2 {strides = array<i32>} : memref<8x128xf32, #tpu.memory_space<vmem>>, vector<8x128xf32>,
    return
  }
  func.func @transform_0(%arg0: i32) -> (i32, i32) {
    %c0_i32 = arith.constant 0 : i32
    %c0_i32_0 = arith.constant 0 : i32
    %c0_i32_1 = arith.constant 0 : i32
    return %c0_i32, %c0_i32_0 : i32, i32
  }
  func.func @transform_1(%arg0: i32) -> (i32, i32) {
    %c0_i32 = arith.constant 0 : i32
    %c0_i32_0 = arith.constant 0 : i32
    return %arg0, %c0_i32 : i32, i32
  }
  func.func @transform_2(%arg0: i32) -> (i32, i32) {
    %c0_i32 = arith.constant 0 : i32
    %c0_i32_0 = arith.constant 0 : i32
    return %arg0, %c0_i32 : i32, i32
  }
}

module attributes {stable_mosaic.version = 11 : i64} {
  func.func @_encoder_layer_kernel(%arg0: i32, %arg1: memref<1x8x32xf32, #tpu.memory_space<vmem>>, %arg2: memref<32x96xbf16, #tpu.memory_space<vmem>>, %arg3: memref<1x96xf32, #tpu.memory_space<vmem>>, %arg4: memref<32x32xbf16, #tpu.memory_space<vmem>>, %arg5: memref<1x32xf32, #tpu.memory_space<vmem>>, %arg6: memref<1x32xf32, #tpu.memory_space<vmem>>, %arg7: memref<1x32xf32, #tpu.memory_space<vmem>>, %arg8: memref<32x64xbf16, #tpu.memory_space<vmem>>, %arg9: memref<1x64xf32, #tpu.memory_space<vmem>>, %arg10: memref<64x32xbf16, #tpu.memory_space<vmem>>, %arg11: memref<1x32xf32, #tpu.memory_space<vmem>>, %arg12: memref<1x32xf32, #tpu.memory_space<vmem>>, %arg13: memref<1x32xf32, #tpu.memory_space<vmem>>, %arg14: memref<1x8x32xf32, #tpu.memory_space<vmem>>) attributes {dimension_semantics = [#tpu.dimension_semantics<parallel>], iteration_bounds = array<i64: 2>, scalar_prefetch = 0 : i64, scratch_operands = 0 : i64, tpu.core_type = #tpu.core_type<tc>, window_params = [{transform_indices = @transform_0, window_bounds = array<i64: 1, 8, 32>}, {pipeline_mode = #tpu.pipeline_mode<synchronous>, transform_indices = @transform_1, window_bounds = array<i64: 32, 96>}, {pipeline_mode = #tpu.pipeline_mode<synchronous>, transform_indices = @transform_2, window_bounds = array<i64: 1, 96>}, {pipeline_mode = #tpu.pipeline_mode<synchronous>, transform_indices = @transform_3, window_bounds = array<i64: 32, 32>}, {pipeline_mode = #tpu.pipeline_mode<synchronous>, transform_indices = @transform_4, window_bounds = array<i64: 1, 32>}, {pipeline_mode = #tpu.pipeline_mode<synchronous>, transform_indices = @transform_5, window_bounds = array<i64: 1, 32>}, {pipeline_mode = #tpu.pipeline_mode<synchronous>, transform_indices = @transform_6, window_bounds = array<i64: 1, 32>}, {pipeline_mode = #tpu.pipeline_mode<synchronous>, transform_indices = @transform_7, window_bounds = array<i64: 32, 64>}, {pipeline_mode = #tpu.pipeline_mode<synchronous>, transform_indices = @transform_8, window_bounds = array<i64: 1, 64>}, {pipeline_mode = #tpu.pipeline_mode<synchronous>, transform_indices = @transform_9, window_bounds = array<i64: 64, 32>}, {pipeline_mode = #tpu.pipeline_mode<synchronous>, transform_indices = @transform_10, window_bounds = array<i64: 1, 32>}, {pipeline_mode = #tpu.pipeline_mode<synchronous>, transform_indices = @transform_11, window_bounds = array<i64: 1, 32>}, {pipeline_mode = #tpu.pipeline_mode<synchronous>, transform_indices = @transform_12, window_bounds = array<i64: 1, 32>}, {transform_indices = @transform_13, window_bounds = array<i64: 1, 8, 32>}]} {
    %c0 = arith.constant 0 : index
    %c0_0 = arith.constant 0 : index
    %c0_1 = arith.constant 0 : index
    %0 = vector.load %arg1[%c0, %c0_0, %c0_1] : memref<1x8x32xf32, #tpu.memory_space<vmem>>, vector<1x8x32xf32>
    %1 = vector.shape_cast %0 : vector<1x8x32xf32> to vector<8x32xf32>
    %2 = arith.truncf %1 : vector<8x32xf32> to vector<8x32xbf16>
    %c0_2 = arith.constant 0 : index
    %c0_3 = arith.constant 0 : index
    %3 = vector.load %arg2[%c0_2, %c0_3] : memref<32x96xbf16, #tpu.memory_space<vmem>>, vector<32x96xbf16>
    %cst = arith.constant dense<0.000000e+00> : vector<8x96xf32>
    %4 = tpu.matmul %2, %3, %cst {dimension_numbers = #tpu.dot_dimension_numbers<[1], [0], [0], [1], [0, 0, 1, 1], [], []>} : vector<8x32xbf16>, vector<32x96xbf16>, vector<8x96xf32> -> vector<8x96xf32>
    %c0_4 = arith.constant 0 : index
    %c0_5 = arith.constant 0 : index
    %5 = vector.load %arg3[%c0_4, %c0_5] : memref<1x96xf32, #tpu.memory_space<vmem>>, vector<1x96xf32>
    %6 = vector.broadcast %5 : vector<1x96xf32> to vector<8x96xf32>
    %7 = arith.addf %4, %6 : vector<8x96xf32>
    %c0_6 = arith.constant 0 : index
    %c0_7 = arith.constant 0 : index
    %8 = vector.load %arg4[%c0_6, %c0_7] : memref<32x32xbf16, #tpu.memory_space<vmem>>, vector<32x32xbf16>
    %cst_8 = arith.constant 0.000000e+00 : f32
    %9 = vector.broadcast %cst_8 : f32 to vector<8x32xf32>
    %c0_9 = arith.constant 0 : index
    %c0_10 = arith.constant 0 : index
    %10 = vector.load %arg5[%c0_9, %c0_10] : memref<1x32xf32, #tpu.memory_space<vmem>>, vector<1x32xf32>
    %11 = vector.broadcast %10 : vector<1x32xf32> to vector<8x32xf32>
    %12 = arith.addf %9, %11 : vector<8x32xf32>
    %13 = vector.extract_strided_slice %7 {offsets = [0, 0], sizes = [8, 4], strides = [1, 1]} : vector<8x96xf32> to vector<8x4xf32>
    %14 = arith.truncf %13 : vector<8x4xf32> to vector<8x4xbf16>
    %15 = vector.shape_cast %14 : vector<8x4xbf16> to vector<1x8x4xbf16>
    %16 = vector.extract_strided_slice %7 {offsets = [0, 32], sizes = [8, 4], strides = [1, 1]} : vector<8x96xf32> to vector<8x4xf32>
    %17 = arith.truncf %16 : vector<8x4xf32> to vector<8x4xbf16>
    %18 = vector.shape_cast %17 : vector<8x4xbf16> to vector<1x8x4xbf16>
    %19 = vector.extract_strided_slice %7 {offsets = [0, 64], sizes = [8, 4], strides = [1, 1]} : vector<8x96xf32> to vector<8x4xf32>
    %20 = arith.truncf %19 : vector<8x4xf32> to vector<8x4xbf16>
    %21 = vector.shape_cast %20 : vector<8x4xbf16> to vector<1x8x4xbf16>
    "tpu.trace_start"() <{level = 10 : i32, message = "bqd,bkd->bqk"}> : () -> ()
    %cst_11 = arith.constant dense<0.000000e+00> : vector<1x8x8xf32>
    %22 = tpu.matmul %15, %18, %cst_11 {dimension_numbers = #tpu.dot_dimension_numbers<[2], [2], [1], [1], [0, 0, 0, 1, 1, 1], [0], [0]>} : vector<1x8x4xbf16>, vector<1x8x4xbf16>, vector<1x8x8xf32> -> vector<1x8x8xf32>
    "tpu.trace_stop"() : () -> ()
    %cst_12 = arith.constant dense<0xFF800000> : vector<1x8xf32>
    %23 = vector.multi_reduction <maximumf>, %22, %cst_12 [2] : vector<1x8x8xf32> to vector<1x8xf32>
    %24 = vector.shape_cast %23 : vector<1x8xf32> to vector<1x8x1xf32>
    %25 = vector.broadcast %24 : vector<1x8x1xf32> to vector<1x8x8xf32>
    %26 = arith.subf %22, %25 : vector<1x8x8xf32>
    %27 = math.exp %26 : vector<1x8x8xf32>
    %28 = arith.truncf %27 : vector<1x8x8xf32> to vector<1x8x8xbf16>
    %29 = arith.extf %28 : vector<1x8x8xbf16> to vector<1x8x8xf32>
    %cst_13 = arith.constant dense<0.000000e+00> : vector<1x8xf32>
    %30 = vector.multi_reduction <add>, %29, %cst_13 [2] : vector<1x8x8xf32> to vector<1x8xf32>
    %31 = vector.shape_cast %30 : vector<1x8xf32> to vector<1x8x1xf32>
    "tpu.trace_start"() <{level = 10 : i32, message = "bqk,bkd->bqd"}> : () -> ()
    %cst_14 = arith.constant dense<0.000000e+00> : vector<1x8x4xf32>
    %32 = tpu.matmul %28, %21, %cst_14 {dimension_numbers = #tpu.dot_dimension_numbers<[2], [1], [1], [2], [0, 0, 0, 1, 1, 2], [0], [0]>} : vector<1x8x8xbf16>, vector<1x8x4xbf16>, vector<1x8x4xf32> -> vector<1x8x4xf32>
    "tpu.trace_stop"() : () -> ()
    %33 = tpu.reciprocal %31 : vector<1x8x1xf32> -> vector<1x8x1xf32>
    %34 = vector.broadcast %33 : vector<1x8x1xf32> to vector<1x8x4xf32>
    %35 = arith.mulf %32, %34 : vector<1x8x4xf32>
    %36 = vector.shape_cast %35 : vector<1x8x4xf32> to vector<8x4xf32>
    %37 = arith.truncf %36 : vector<8x4xf32> to vector<8x4xbf16>
    %38 = vector.extract_strided_slice %8 {offsets = [0, 0], sizes = [4, 32], strides = [1, 1]} : vector<32x32xbf16> to vector<4x32xbf16>
    %cst_15 = arith.constant dense<0.000000e+00> : vector<8x32xf32>
    %39 = tpu.matmul %37, %38, %cst_15 {dimension_numbers = #tpu.dot_dimension_numbers<[1], [0], [0], [1], [0, 0, 1, 1], [], []>} : vector<8x4xbf16>, vector<4x32xbf16>, vector<8x32xf32> -> vector<8x32xf32>
    %40 = arith.addf %12, %39 : vector<8x32xf32>
    %41 = vector.extract_strided_slice %7 {offsets = [0, 4], sizes = [8, 4], strides = [1, 1]} : vector<8x96xf32> to vector<8x4xf32>
    %42 = arith.truncf %41 : vector<8x4xf32> to vector<8x4xbf16>
    %43 = vector.shape_cast %42 : vector<8x4xbf16> to vector<1x8x4xbf16>
    %44 = vector.extract_strided_slice %7 {offsets = [0, 36], sizes = [8, 4], strides = [1, 1]} : vector<8x96xf32> to vector<8x4xf32>
    %45 = arith.truncf %44 : vector<8x4xf32> to vector<8x4xbf16>
    %46 = vector.shape_cast %45 : vector<8x4xbf16> to vector<1x8x4xbf16>
    %47 = vector.extract_strided_slice %7 {offsets = [0, 68], sizes = [8, 4], strides = [1, 1]} : vector<8x96xf32> to vector<8x4xf32>
    %48 = arith.truncf %47 : vector<8x4xf32> to vector<8x4xbf16>
    %49 = vector.shape_cast %48 : vector<8x4xbf16> to vector<1x8x4xbf16>
    "tpu.trace_start"() <{level = 10 : i32, message = "bqd,bkd->bqk"}> : () -> ()
    %cst_16 = arith.constant dense<0.000000e+00> : vector<1x8x8xf32>
    %50 = tpu.matmul %43, %46, %cst_16 {dimension_numbers = #tpu.dot_dimension_numbers<[2], [2], [1], [1], [0, 0, 0, 1, 1, 1], [0], [0]>} : vector<1x8x4xbf16>, vector<1x8x4xbf16>, vector<1x8x8xf32> -> vector<1x8x8xf32>
    "tpu.trace_stop"() : () -> ()
    %cst_17 = arith.constant dense<0xFF800000> : vector<1x8xf32>
    %51 = vector.multi_reduction <maximumf>, %50, %cst_17 [2] : vector<1x8x8xf32> to vector<1x8xf32>
    %52 = vector.shape_cast %51 : vector<1x8xf32> to vector<1x8x1xf32>
    %53 = vector.broadcast %52 : vector<1x8x1xf32> to vector<1x8x8xf32>
    %54 = arith.subf %50, %53 : vector<1x8x8xf32>
    %55 = math.exp %54 : vector<1x8x8xf32>
    %56 = arith.truncf %55 : vector<1x8x8xf32> to vector<1x8x8xbf16>
    %57 = arith.extf %56 : vector<1x8x8xbf16> to vector<1x8x8xf32>
    %cst_18 = arith.constant dense<0.000000e+00> : vector<1x8xf32>
    %58 = vector.multi_reduction <add>, %57, %cst_18 [2] : vector<1x8x8xf32> to vector<1x8xf32>
    %59 = vector.shape_cast %58 : vector<1x8xf32> to vector<1x8x1xf32>
    "tpu.trace_start"() <{level = 10 : i32, message = "bqk,bkd->bqd"}> : () -> ()
    %cst_19 = arith.constant dense<0.000000e+00> : vector<1x8x4xf32>
    %60 = tpu.matmul %56, %49, %cst_19 {dimension_numbers = #tpu.dot_dimension_numbers<[2], [1], [1], [2], [0, 0, 0, 1, 1, 2], [0], [0]>} : vector<1x8x8xbf16>, vector<1x8x4xbf16>, vector<1x8x4xf32> -> vector<1x8x4xf32>
    "tpu.trace_stop"() : () -> ()
    %61 = tpu.reciprocal %59 : vector<1x8x1xf32> -> vector<1x8x1xf32>
    %62 = vector.broadcast %61 : vector<1x8x1xf32> to vector<1x8x4xf32>
    %63 = arith.mulf %60, %62 : vector<1x8x4xf32>
    %64 = vector.shape_cast %63 : vector<1x8x4xf32> to vector<8x4xf32>
    %65 = arith.truncf %64 : vector<8x4xf32> to vector<8x4xbf16>
    %66 = vector.extract_strided_slice %8 {offsets = [4, 0], sizes = [4, 32], strides = [1, 1]} : vector<32x32xbf16> to vector<4x32xbf16>
    %cst_20 = arith.constant dense<0.000000e+00> : vector<8x32xf32>
    %67 = tpu.matmul %65, %66, %cst_20 {dimension_numbers = #tpu.dot_dimension_numbers<[1], [0], [0], [1], [0, 0, 1, 1], [], []>} : vector<8x4xbf16>, vector<4x32xbf16>, vector<8x32xf32> -> vector<8x32xf32>
    %68 = arith.addf %40, %67 : vector<8x32xf32>
    %69 = vector.extract_strided_slice %7 {offsets = [0, 8], sizes = [8, 4], strides = [1, 1]} : vector<8x96xf32> to vector<8x4xf32>
    %70 = arith.truncf %69 : vector<8x4xf32> to vector<8x4xbf16>
    %71 = vector.shape_cast %70 : vector<8x4xbf16> to vector<1x8x4xbf16>
    %72 = vector.extract_strided_slice %7 {offsets = [0, 40], sizes = [8, 4], strides = [1, 1]} : vector<8x96xf32> to vector<8x4xf32>
    %73 = arith.truncf %72 : vector<8x4xf32> to vector<8x4xbf16>
    %74 = vector.shape_cast %73 : vector<8x4xbf16> to vector<1x8x4xbf16>
    %75 = vector.extract_strided_slice %7 {offsets = [0, 72], sizes = [8, 4], strides = [1, 1]} : vector<8x96xf32> to vector<8x4xf32>
    %76 = arith.truncf %75 : vector<8x4xf32> to vector<8x4xbf16>
    %77 = vector.shape_cast %76 : vector<8x4xbf16> to vector<1x8x4xbf16>
    "tpu.trace_start"() <{level = 10 : i32, message = "bqd,bkd->bqk"}> : () -> ()
    %cst_21 = arith.constant dense<0.000000e+00> : vector<1x8x8xf32>
    %78 = tpu.matmul %71, %74, %cst_21 {dimension_numbers = #tpu.dot_dimension_numbers<[2], [2], [1], [1], [0, 0, 0, 1, 1, 1], [0], [0]>} : vector<1x8x4xbf16>, vector<1x8x4xbf16>, vector<1x8x8xf32> -> vector<1x8x8xf32>
    "tpu.trace_stop"() : () -> ()
    %cst_22 = arith.constant dense<0xFF800000> : vector<1x8xf32>
    %79 = vector.multi_reduction <maximumf>, %78, %cst_22 [2] : vector<1x8x8xf32> to vector<1x8xf32>
    %80 = vector.shape_cast %79 : vector<1x8xf32> to vector<1x8x1xf32>
    %81 = vector.broadcast %80 : vector<1x8x1xf32> to vector<1x8x8xf32>
    %82 = arith.subf %78, %81 : vector<1x8x8xf32>
    %83 = math.exp %82 : vector<1x8x8xf32>
    %84 = arith.truncf %83 : vector<1x8x8xf32> to vector<1x8x8xbf16>
    %85 = arith.extf %84 : vector<1x8x8xbf16> to vector<1x8x8xf32>
    %cst_23 = arith.constant dense<0.000000e+00> : vector<1x8xf32>
    %86 = vector.multi_reduction <add>, %85, %cst_23 [2] : vector<1x8x8xf32> to vector<1x8xf32>
    %87 = vector.shape_cast %86 : vector<1x8xf32> to vector<1x8x1xf32>
    "tpu.trace_start"() <{level = 10 : i32, message = "bqk,bkd->bqd"}> : () -> ()
    %cst_24 = arith.constant dense<0.000000e+00> : vector<1x8x4xf32>
    %88 = tpu.matmul %84, %77, %cst_24 {dimension_numbers = #tpu.dot_dimension_numbers<[2], [1], [1], [2], [0, 0, 0, 1, 1, 2], [0], [0]>} : vector<1x8x8xbf16>, vector<1x8x4xbf16>, vector<1x8x4xf32> -> vector<1x8x4xf32>
    "tpu.trace_stop"() : () -> ()
    %89 = tpu.reciprocal %87 : vector<1x8x1xf32> -> vector<1x8x1xf32>
    %90 = vector.broadcast %89 : vector<1x8x1xf32> to vector<1x8x4xf32>
    %91 = arith.mulf %88, %90 : vector<1x8x4xf32>
    %92 = vector.shape_cast %91 : vector<1x8x4xf32> to vector<8x4xf32>
    %93 = arith.truncf %92 : vector<8x4xf32> to vector<8x4xbf16>
    %94 = vector.extract_strided_slice %8 {offsets = [8, 0], sizes = [4, 32], strides = [1, 1]} : vector<32x32xbf16> to vector<4x32xbf16>
    %cst_25 = arith.constant dense<0.000000e+00> : vector<8x32xf32>
    %95 = tpu.matmul %93, %94, %cst_25 {dimension_numbers = #tpu.dot_dimension_numbers<[1], [0], [0], [1], [0, 0, 1, 1], [], []>} : vector<8x4xbf16>, vector<4x32xbf16>, vector<8x32xf32> -> vector<8x32xf32>
    %96 = arith.addf %68, %95 : vector<8x32xf32>
    %97 = vector.extract_strided_slice %7 {offsets = [0, 12], sizes = [8, 4], strides = [1, 1]} : vector<8x96xf32> to vector<8x4xf32>
    %98 = arith.truncf %97 : vector<8x4xf32> to vector<8x4xbf16>
    %99 = vector.shape_cast %98 : vector<8x4xbf16> to vector<1x8x4xbf16>
    %100 = vector.extract_strided_slice %7 {offsets = [0, 44], sizes = [8, 4], strides = [1, 1]} : vector<8x96xf32> to vector<8x4xf32>
    %101 = arith.truncf %100 : vector<8x4xf32> to vector<8x4xbf16>
    %102 = vector.shape_cast %101 : vector<8x4xbf16> to vector<1x8x4xbf16>
    %103 = vector.extract_strided_slice %7 {offsets = [0, 76], sizes = [8, 4], strides = [1, 1]} : vector<8x96xf32> to vector<8x4xf32>
    %104 = arith.truncf %103 : vector<8x4xf32> to vector<8x4xbf16>
    %105 = vector.shape_cast %104 : vector<8x4xbf16> to vector<1x8x4xbf16>
    "tpu.trace_start"() <{level = 10 : i32, message = "bqd,bkd->bqk"}> : () -> ()
    %cst_26 = arith.constant dense<0.000000e+00> : vector<1x8x8xf32>
    %106 = tpu.matmul %99, %102, %cst_26 {dimension_numbers = #tpu.dot_dimension_numbers<[2], [2], [1], [1], [0, 0, 0, 1, 1, 1], [0], [0]>} : vector<1x8x4xbf16>, vector<1x8x4xbf16>, vector<1x8x8xf32> -> vector<1x8x8xf32>
    "tpu.trace_stop"() : () -> ()
    %cst_27 = arith.constant dense<0xFF800000> : vector<1x8xf32>
    %107 = vector.multi_reduction <maximumf>, %106, %cst_27 [2] : vector<1x8x8xf32> to vector<1x8xf32>
    %108 = vector.shape_cast %107 : vector<1x8xf32> to vector<1x8x1xf32>
    %109 = vector.broadcast %108 : vector<1x8x1xf32> to vector<1x8x8xf32>
    %110 = arith.subf %106, %109 : vector<1x8x8xf32>
    %111 = math.exp %110 : vector<1x8x8xf32>
    %112 = arith.truncf %111 : vector<1x8x8xf32> to vector<1x8x8xbf16>
    %113 = arith.extf %112 : vector<1x8x8xbf16> to vector<1x8x8xf32>
    %cst_28 = arith.constant dense<0.000000e+00> : vector<1x8xf32>
    %114 = vector.multi_reduction <add>, %113, %cst_28 [2] : vector<1x8x8xf32> to vector<1x8xf32>
    %115 = vector.shape_cast %114 : vector<1x8xf32> to vector<1x8x1xf32>
    "tpu.trace_start"() <{level = 10 : i32, message = "bqk,bkd->bqd"}> : () -> ()
    %cst_29 = arith.constant dense<0.000000e+00> : vector<1x8x4xf32>
    %116 = tpu.matmul %112, %105, %cst_29 {dimension_numbers = #tpu.dot_dimension_numbers<[2], [1], [1], [2], [0, 0, 0, 1, 1, 2], [0], [0]>} : vector<1x8x8xbf16>, vector<1x8x4xbf16>, vector<1x8x4xf32> -> vector<1x8x4xf32>
    "tpu.trace_stop"() : () -> ()
    %117 = tpu.reciprocal %115 : vector<1x8x1xf32> -> vector<1x8x1xf32>
    %118 = vector.broadcast %117 : vector<1x8x1xf32> to vector<1x8x4xf32>
    %119 = arith.mulf %116, %118 : vector<1x8x4xf32>
    %120 = vector.shape_cast %119 : vector<1x8x4xf32> to vector<8x4xf32>
    %121 = arith.truncf %120 : vector<8x4xf32> to vector<8x4xbf16>
    %122 = vector.extract_strided_slice %8 {offsets = [12, 0], sizes = [4, 32], strides = [1, 1]} : vector<32x32xbf16> to vector<4x32xbf16>
    %cst_30 = arith.constant dense<0.000000e+00> : vector<8x32xf32>
    %123 = tpu.matmul %121, %122, %cst_30 {dimension_numbers = #tpu.dot_dimension_numbers<[1], [0], [0], [1], [0, 0, 1, 1], [], []>} : vector<8x4xbf16>, vector<4x32xbf16>, vector<8x32xf32> -> vector<8x32xf32>
    %124 = arith.addf %96, %123 : vector<8x32xf32>
    %125 = vector.extract_strided_slice %7 {offsets = [0, 16], sizes = [8, 4], strides = [1, 1]} : vector<8x96xf32> to vector<8x4xf32>
    %126 = arith.truncf %125 : vector<8x4xf32> to vector<8x4xbf16>
    %127 = vector.shape_cast %126 : vector<8x4xbf16> to vector<1x8x4xbf16>
    %128 = vector.extract_strided_slice %7 {offsets = [0, 48], sizes = [8, 4], strides = [1, 1]} : vector<8x96xf32> to vector<8x4xf32>
    %129 = arith.truncf %128 : vector<8x4xf32> to vector<8x4xbf16>
    %130 = vector.shape_cast %129 : vector<8x4xbf16> to vector<1x8x4xbf16>
    %131 = vector.extract_strided_slice %7 {offsets = [0, 80], sizes = [8, 4], strides = [1, 1]} : vector<8x96xf32> to vector<8x4xf32>
    %132 = arith.truncf %131 : vector<8x4xf32> to vector<8x4xbf16>
    %133 = vector.shape_cast %132 : vector<8x4xbf16> to vector<1x8x4xbf16>
    "tpu.trace_start"() <{level = 10 : i32, message = "bqd,bkd->bqk"}> : () -> ()
    %cst_31 = arith.constant dense<0.000000e+00> : vector<1x8x8xf32>
    %134 = tpu.matmul %127, %130, %cst_31 {dimension_numbers = #tpu.dot_dimension_numbers<[2], [2], [1], [1], [0, 0, 0, 1, 1, 1], [0], [0]>} : vector<1x8x4xbf16>, vector<1x8x4xbf16>, vector<1x8x8xf32> -> vector<1x8x8xf32>
    "tpu.trace_stop"() : () -> ()
    %cst_32 = arith.constant dense<0xFF800000> : vector<1x8xf32>
    %135 = vector.multi_reduction <maximumf>, %134, %cst_32 [2] : vector<1x8x8xf32> to vector<1x8xf32>
    %136 = vector.shape_cast %135 : vector<1x8xf32> to vector<1x8x1xf32>
    %137 = vector.broadcast %136 : vector<1x8x1xf32> to vector<1x8x8xf32>
    %138 = arith.subf %134, %137 : vector<1x8x8xf32>
    %139 = math.exp %138 : vector<1x8x8xf32>
    %140 = arith.truncf %139 : vector<1x8x8xf32> to vector<1x8x8xbf16>
    %141 = arith.extf %140 : vector<1x8x8xbf16> to vector<1x8x8xf32>
    %cst_33 = arith.constant dense<0.000000e+00> : vector<1x8xf32>
    %142 = vector.multi_reduction <add>, %141, %cst_33 [2] : vector<1x8x8xf32> to vector<1x8xf32>
    %143 = vector.shape_cast %142 : vector<1x8xf32> to vector<1x8x1xf32>
    "tpu.trace_start"() <{level = 10 : i32, message = "bqk,bkd->bqd"}> : () -> ()
    %cst_34 = arith.constant dense<0.000000e+00> : vector<1x8x4xf32>
    %144 = tpu.matmul %140, %133, %cst_34 {dimension_numbers = #tpu.dot_dimension_numbers<[2], [1], [1], [2], [0, 0, 0, 1, 1, 2], [0], [0]>} : vector<1x8x8xbf16>, vector<1x8x4xbf16>, vector<1x8x4xf32> -> vector<1x8x4xf32>
    "tpu.trace_stop"() : () -> ()
    %145 = tpu.reciprocal %143 : vector<1x8x1xf32> -> vector<1x8x1xf32>
    %146 = vector.broadcast %145 : vector<1x8x1xf32> to vector<1x8x4xf32>
    %147 = arith.mulf %144, %146 : vector<1x8x4xf32>
    %148 = vector.shape_cast %147 : vector<1x8x4xf32> to vector<8x4xf32>
    %149 = arith.truncf %148 : vector<8x4xf32> to vector<8x4xbf16>
    %150 = vector.extract_strided_slice %8 {offsets = [16, 0], sizes = [4, 32], strides = [1, 1]} : vector<32x32xbf16> to vector<4x32xbf16>
    %cst_35 = arith.constant dense<0.000000e+00> : vector<8x32xf32>
    %151 = tpu.matmul %149, %150, %cst_35 {dimension_numbers = #tpu.dot_dimension_numbers<[1], [0], [0], [1], [0, 0, 1, 1], [], []>} : vector<8x4xbf16>, vector<4x32xbf16>, vector<8x32xf32> -> vector<8x32xf32>
    %152 = arith.addf %124, %151 : vector<8x32xf32>
    %153 = vector.extract_strided_slice %7 {offsets = [0, 20], sizes = [8, 4], strides = [1, 1]} : vector<8x96xf32> to vector<8x4xf32>
    %154 = arith.truncf %153 : vector<8x4xf32> to vector<8x4xbf16>
    %155 = vector.shape_cast %154 : vector<8x4xbf16> to vector<1x8x4xbf16>
    %156 = vector.extract_strided_slice %7 {offsets = [0, 52], sizes = [8, 4], strides = [1, 1]} : vector<8x96xf32> to vector<8x4xf32>
    %157 = arith.truncf %156 : vector<8x4xf32> to vector<8x4xbf16>
    %158 = vector.shape_cast %157 : vector<8x4xbf16> to vector<1x8x4xbf16>
    %159 = vector.extract_strided_slice %7 {offsets = [0, 84], sizes = [8, 4], strides = [1, 1]} : vector<8x96xf32> to vector<8x4xf32>
    %160 = arith.truncf %159 : vector<8x4xf32> to vector<8x4xbf16>
    %161 = vector.shape_cast %160 : vector<8x4xbf16> to vector<1x8x4xbf16>
    "tpu.trace_start"() <{level = 10 : i32, message = "bqd,bkd->bqk"}> : () -> ()
    %cst_36 = arith.constant dense<0.000000e+00> : vector<1x8x8xf32>
    %162 = tpu.matmul %155, %158, %cst_36 {dimension_numbers = #tpu.dot_dimension_numbers<[2], [2], [1], [1], [0, 0, 0, 1, 1, 1], [0], [0]>} : vector<1x8x4xbf16>, vector<1x8x4xbf16>, vector<1x8x8xf32> -> vector<1x8x8xf32>
    "tpu.trace_stop"() : () -> ()
    %cst_37 = arith.constant dense<0xFF800000> : vector<1x8xf32>
    %163 = vector.multi_reduction <maximumf>, %162, %cst_37 [2] : vector<1x8x8xf32> to vector<1x8xf32>
    %164 = vector.shape_cast %163 : vector<1x8xf32> to vector<1x8x1xf32>
    %165 = vector.broadcast %164 : vector<1x8x1xf32> to vector<1x8x8xf32>
    %166 = arith.subf %162, %165 : vector<1x8x8xf32>
    %167 = math.exp %166 : vector<1x8x8xf32>
    %168 = arith.truncf %167 : vector<1x8x8xf32> to vector<1x8x8xbf16>
    %169 = arith.extf %168 : vector<1x8x8xbf16> to vector<1x8x8xf32>
    %cst_38 = arith.constant dense<0.000000e+00> : vector<1x8xf32>
    %170 = vector.multi_reduction <add>, %169, %cst_38 [2] : vector<1x8x8xf32> to vector<1x8xf32>
    %171 = vector.shape_cast %170 : vector<1x8xf32> to vector<1x8x1xf32>
    "tpu.trace_start"() <{level = 10 : i32, message = "bqk,bkd->bqd"}> : () -> ()
    %cst_39 = arith.constant dense<0.000000e+00> : vector<1x8x4xf32>
    %172 = tpu.matmul %168, %161, %cst_39 {dimension_numbers = #tpu.dot_dimension_numbers<[2], [1], [1], [2], [0, 0, 0, 1, 1, 2], [0], [0]>} : vector<1x8x8xbf16>, vector<1x8x4xbf16>, vector<1x8x4xf32> -> vector<1x8x4xf32>
    "tpu.trace_stop"() : () -> ()
    %173 = tpu.reciprocal %171 : vector<1x8x1xf32> -> vector<1x8x1xf32>
    %174 = vector.broadcast %173 : vector<1x8x1xf32> to vector<1x8x4xf32>
    %175 = arith.mulf %172, %174 : vector<1x8x4xf32>
    %176 = vector.shape_cast %175 : vector<1x8x4xf32> to vector<8x4xf32>
    %177 = arith.truncf %176 : vector<8x4xf32> to vector<8x4xbf16>
    %178 = vector.extract_strided_slice %8 {offsets = [20, 0], sizes = [4, 32], strides = [1, 1]} : vector<32x32xbf16> to vector<4x32xbf16>
    %cst_40 = arith.constant dense<0.000000e+00> : vector<8x32xf32>
    %179 = tpu.matmul %177, %178, %cst_40 {dimension_numbers = #tpu.dot_dimension_numbers<[1], [0], [0], [1], [0, 0, 1, 1], [], []>} : vector<8x4xbf16>, vector<4x32xbf16>, vector<8x32xf32> -> vector<8x32xf32>
    %180 = arith.addf %152, %179 : vector<8x32xf32>
    %181 = vector.extract_strided_slice %7 {offsets = [0, 24], sizes = [8, 4], strides = [1, 1]} : vector<8x96xf32> to vector<8x4xf32>
    %182 = arith.truncf %181 : vector<8x4xf32> to vector<8x4xbf16>
    %183 = vector.shape_cast %182 : vector<8x4xbf16> to vector<1x8x4xbf16>
    %184 = vector.extract_strided_slice %7 {offsets = [0, 56], sizes = [8, 4], strides = [1, 1]} : vector<8x96xf32> to vector<8x4xf32>
    %185 = arith.truncf %184 : vector<8x4xf32> to vector<8x4xbf16>
    %186 = vector.shape_cast %185 : vector<8x4xbf16> to vector<1x8x4xbf16>
    %187 = vector.extract_strided_slice %7 {offsets = [0, 88], sizes = [8, 4], strides = [1, 1]} : vector<8x96xf32> to vector<8x4xf32>
    %188 = arith.truncf %187 : vector<8x4xf32> to vector<8x4xbf16>
    %189 = vector.shape_cast %188 : vector<8x4xbf16> to vector<1x8x4xbf16>
    "tpu.trace_start"() <{level = 10 : i32, message = "bqd,bkd->bqk"}> : () -> ()
    %cst_41 = arith.constant dense<0.000000e+00> : vector<1x8x8xf32>
    %190 = tpu.matmul %183, %186, %cst_41 {dimension_numbers = #tpu.dot_dimension_numbers<[2], [2], [1], [1], [0, 0, 0, 1, 1, 1], [0], [0]>} : vector<1x8x4xbf16>, vector<1x8x4xbf16>, vector<1x8x8xf32> -> vector<1x8x8xf32>
    "tpu.trace_stop"() : () -> ()
    %cst_42 = arith.constant dense<0xFF800000> : vector<1x8xf32>
    %191 = vector.multi_reduction <maximumf>, %190, %cst_42 [2] : vector<1x8x8xf32> to vector<1x8xf32>
    %192 = vector.shape_cast %191 : vector<1x8xf32> to vector<1x8x1xf32>
    %193 = vector.broadcast %192 : vector<1x8x1xf32> to vector<1x8x8xf32>
    %194 = arith.subf %190, %193 : vector<1x8x8xf32>
    %195 = math.exp %194 : vector<1x8x8xf32>
    %196 = arith.truncf %195 : vector<1x8x8xf32> to vector<1x8x8xbf16>
    %197 = arith.extf %196 : vector<1x8x8xbf16> to vector<1x8x8xf32>
    %cst_43 = arith.constant dense<0.000000e+00> : vector<1x8xf32>
    %198 = vector.multi_reduction <add>, %197, %cst_43 [2] : vector<1x8x8xf32> to vector<1x8xf32>
    %199 = vector.shape_cast %198 : vector<1x8xf32> to vector<1x8x1xf32>
    "tpu.trace_start"() <{level = 10 : i32, message = "bqk,bkd->bqd"}> : () -> ()
    %cst_44 = arith.constant dense<0.000000e+00> : vector<1x8x4xf32>
    %200 = tpu.matmul %196, %189, %cst_44 {dimension_numbers = #tpu.dot_dimension_numbers<[2], [1], [1], [2], [0, 0, 0, 1, 1, 2], [0], [0]>} : vector<1x8x8xbf16>, vector<1x8x4xbf16>, vector<1x8x4xf32> -> vector<1x8x4xf32>
    "tpu.trace_stop"() : () -> ()
    %201 = tpu.reciprocal %199 : vector<1x8x1xf32> -> vector<1x8x1xf32>
    %202 = vector.broadcast %201 : vector<1x8x1xf32> to vector<1x8x4xf32>
    %203 = arith.mulf %200, %202 : vector<1x8x4xf32>
    %204 = vector.shape_cast %203 : vector<1x8x4xf32> to vector<8x4xf32>
    %205 = arith.truncf %204 : vector<8x4xf32> to vector<8x4xbf16>
    %206 = vector.extract_strided_slice %8 {offsets = [24, 0], sizes = [4, 32], strides = [1, 1]} : vector<32x32xbf16> to vector<4x32xbf16>
    %cst_45 = arith.constant dense<0.000000e+00> : vector<8x32xf32>
    %207 = tpu.matmul %205, %206, %cst_45 {dimension_numbers = #tpu.dot_dimension_numbers<[1], [0], [0], [1], [0, 0, 1, 1], [], []>} : vector<8x4xbf16>, vector<4x32xbf16>, vector<8x32xf32> -> vector<8x32xf32>
    %208 = arith.addf %180, %207 : vector<8x32xf32>
    %209 = vector.extract_strided_slice %7 {offsets = [0, 28], sizes = [8, 4], strides = [1, 1]} : vector<8x96xf32> to vector<8x4xf32>
    %210 = arith.truncf %209 : vector<8x4xf32> to vector<8x4xbf16>
    %211 = vector.shape_cast %210 : vector<8x4xbf16> to vector<1x8x4xbf16>
    %212 = vector.extract_strided_slice %7 {offsets = [0, 60], sizes = [8, 4], strides = [1, 1]} : vector<8x96xf32> to vector<8x4xf32>
    %213 = arith.truncf %212 : vector<8x4xf32> to vector<8x4xbf16>
    %214 = vector.shape_cast %213 : vector<8x4xbf16> to vector<1x8x4xbf16>
    %215 = vector.extract_strided_slice %7 {offsets = [0, 92], sizes = [8, 4], strides = [1, 1]} : vector<8x96xf32> to vector<8x4xf32>
    %216 = arith.truncf %215 : vector<8x4xf32> to vector<8x4xbf16>
    %217 = vector.shape_cast %216 : vector<8x4xbf16> to vector<1x8x4xbf16>
    "tpu.trace_start"() <{level = 10 : i32, message = "bqd,bkd->bqk"}> : () -> ()
    %cst_46 = arith.constant dense<0.000000e+00> : vector<1x8x8xf32>
    %218 = tpu.matmul %211, %214, %cst_46 {dimension_numbers = #tpu.dot_dimension_numbers<[2], [2], [1], [1], [0, 0, 0, 1, 1, 1], [0], [0]>} : vector<1x8x4xbf16>, vector<1x8x4xbf16>, vector<1x8x8xf32> -> vector<1x8x8xf32>
    "tpu.trace_stop"() : () -> ()
    %cst_47 = arith.constant dense<0xFF800000> : vector<1x8xf32>
    %219 = vector.multi_reduction <maximumf>, %218, %cst_47 [2] : vector<1x8x8xf32> to vector<1x8xf32>
    %220 = vector.shape_cast %219 : vector<1x8xf32> to vector<1x8x1xf32>
    %221 = vector.broadcast %220 : vector<1x8x1xf32> to vector<1x8x8xf32>
    %222 = arith.subf %218, %221 : vector<1x8x8xf32>
    %223 = math.exp %222 : vector<1x8x8xf32>
    %224 = arith.truncf %223 : vector<1x8x8xf32> to vector<1x8x8xbf16>
    %225 = arith.extf %224 : vector<1x8x8xbf16> to vector<1x8x8xf32>
    %cst_48 = arith.constant dense<0.000000e+00> : vector<1x8xf32>
    %226 = vector.multi_reduction <add>, %225, %cst_48 [2] : vector<1x8x8xf32> to vector<1x8xf32>
    %227 = vector.shape_cast %226 : vector<1x8xf32> to vector<1x8x1xf32>
    "tpu.trace_start"() <{level = 10 : i32, message = "bqk,bkd->bqd"}> : () -> ()
    %cst_49 = arith.constant dense<0.000000e+00> : vector<1x8x4xf32>
    %228 = tpu.matmul %224, %217, %cst_49 {dimension_numbers = #tpu.dot_dimension_numbers<[2], [1], [1], [2], [0, 0, 0, 1, 1, 2], [0], [0]>} : vector<1x8x8xbf16>, vector<1x8x4xbf16>, vector<1x8x4xf32> -> vector<1x8x4xf32>
    "tpu.trace_stop"() : () -> ()
    %229 = tpu.reciprocal %227 : vector<1x8x1xf32> -> vector<1x8x1xf32>
    %230 = vector.broadcast %229 : vector<1x8x1xf32> to vector<1x8x4xf32>
    %231 = arith.mulf %228, %230 : vector<1x8x4xf32>
    %232 = vector.shape_cast %231 : vector<1x8x4xf32> to vector<8x4xf32>
    %233 = arith.truncf %232 : vector<8x4xf32> to vector<8x4xbf16>
    %234 = vector.extract_strided_slice %8 {offsets = [28, 0], sizes = [4, 32], strides = [1, 1]} : vector<32x32xbf16> to vector<4x32xbf16>
    %cst_50 = arith.constant dense<0.000000e+00> : vector<8x32xf32>
    %235 = tpu.matmul %233, %234, %cst_50 {dimension_numbers = #tpu.dot_dimension_numbers<[1], [0], [0], [1], [0, 0, 1, 1], [], []>} : vector<8x4xbf16>, vector<4x32xbf16>, vector<8x32xf32> -> vector<8x32xf32>
    %236 = arith.addf %208, %235 : vector<8x32xf32>
    %237 = arith.addf %1, %236 : vector<8x32xf32>
    %c0_51 = arith.constant 0 : index
    %c0_52 = arith.constant 0 : index
    %238 = vector.load %arg6[%c0_51, %c0_52] : memref<1x32xf32, #tpu.memory_space<vmem>>, vector<1x32xf32>
    %c0_53 = arith.constant 0 : index
    %c0_54 = arith.constant 0 : index
    %239 = vector.load %arg7[%c0_53, %c0_54] : memref<1x32xf32, #tpu.memory_space<vmem>>, vector<1x32xf32>
    %cst_55 = arith.constant dense<0.000000e+00> : vector<8xf32>
    %240 = vector.multi_reduction <add>, %237, %cst_55 [1] : vector<8x32xf32> to vector<8xf32>
    %241 = vector.shape_cast %240 : vector<8xf32> to vector<8x1xf32>
    %cst_56 = arith.constant 3.200000e+01 : f32
    %242 = vector.broadcast %cst_56 : f32 to vector<8x1xf32>
    %243 = arith.divf %241, %242 : vector<8x1xf32>
    %244 = vector.broadcast %243 : vector<8x1xf32> to vector<8x32xf32>
    %245 = arith.subf %237, %244 : vector<8x32xf32>
    %246 = arith.mulf %245, %245 : vector<8x32xf32>
    %cst_57 = arith.constant dense<0.000000e+00> : vector<8xf32>
    %247 = vector.multi_reduction <add>, %246, %cst_57 [1] : vector<8x32xf32> to vector<8xf32>
    %248 = vector.shape_cast %247 : vector<8xf32> to vector<8x1xf32>
    %cst_58 = arith.constant 3.200000e+01 : f32
    %249 = vector.broadcast %cst_58 : f32 to vector<8x1xf32>
    %250 = arith.divf %248, %249 : vector<8x1xf32>
    %cst_59 = arith.constant 9.99999974E-6 : f32
    %251 = vector.broadcast %cst_59 : f32 to vector<8x1xf32>
    %252 = arith.addf %250, %251 : vector<8x1xf32>
    %253 = math.rsqrt %252 : vector<8x1xf32>
    %254 = vector.broadcast %253 : vector<8x1xf32> to vector<8x32xf32>
    %255 = arith.mulf %245, %254 : vector<8x32xf32>
    %256 = vector.broadcast %238 : vector<1x32xf32> to vector<8x32xf32>
    %257 = arith.mulf %255, %256 : vector<8x32xf32>
    %258 = vector.broadcast %239 : vector<1x32xf32> to vector<8x32xf32>
    %259 = arith.addf %257, %258 : vector<8x32xf32>
    %260 = arith.truncf %259 : vector<8x32xf32> to vector<8x32xbf16>
    %c0_60 = arith.constant 0 : index
    %c0_61 = arith.constant 0 : index
    %261 = vector.load %arg8[%c0_60, %c0_61] : memref<32x64xbf16, #tpu.memory_space<vmem>>, vector<32x64xbf16>
    %cst_62 = arith.constant dense<0.000000e+00> : vector<8x64xf32>
    %262 = tpu.matmul %260, %261, %cst_62 {dimension_numbers = #tpu.dot_dimension_numbers<[1], [0], [0], [1], [0, 0, 1, 1], [], []>} : vector<8x32xbf16>, vector<32x64xbf16>, vector<8x64xf32> -> vector<8x64xf32>
    %c0_63 = arith.constant 0 : index
    %c0_64 = arith.constant 0 : index
    %263 = vector.load %arg9[%c0_63, %c0_64] : memref<1x64xf32, #tpu.memory_space<vmem>>, vector<1x64xf32>
    %264 = vector.broadcast %263 : vector<1x64xf32> to vector<8x64xf32>
    %265 = arith.addf %262, %264 : vector<8x64xf32>
    %cst_65 = arith.constant 0.000000e+00 : f32
    %266 = vector.broadcast %cst_65 : f32 to vector<8x64xf32>
    %267 = arith.maximumf %265, %266 : vector<8x64xf32>
    %268 = arith.truncf %267 : vector<8x64xf32> to vector<8x64xbf16>
    %c0_66 = arith.constant 0 : index
    %c0_67 = arith.constant 0 : index
    %269 = vector.load %arg10[%c0_66, %c0_67] : memref<64x32xbf16, #tpu.memory_space<vmem>>, vector<64x32xbf16>
    %cst_68 = arith.constant dense<0.000000e+00> : vector<8x32xf32>
    %270 = tpu.matmul %268, %269, %cst_68 {dimension_numbers = #tpu.dot_dimension_numbers<[1], [0], [0], [1], [0, 0, 1, 1], [], []>} : vector<8x64xbf16>, vector<64x32xbf16>, vector<8x32xf32> -> vector<8x32xf32>
    %c0_69 = arith.constant 0 : index
    %c0_70 = arith.constant 0 : index
    %271 = vector.load %arg11[%c0_69, %c0_70] : memref<1x32xf32, #tpu.memory_space<vmem>>, vector<1x32xf32>
    %272 = vector.broadcast %271 : vector<1x32xf32> to vector<8x32xf32>
    %273 = arith.addf %270, %272 : vector<8x32xf32>
    %274 = arith.addf %259, %273 : vector<8x32xf32>
    %c0_71 = arith.constant 0 : index
    %c0_72 = arith.constant 0 : index
    %275 = vector.load %arg12[%c0_71, %c0_72] : memref<1x32xf32, #tpu.memory_space<vmem>>, vector<1x32xf32>
    %c0_73 = arith.constant 0 : index
    %c0_74 = arith.constant 0 : index
    %276 = vector.load %arg13[%c0_73, %c0_74] : memref<1x32xf32, #tpu.memory_space<vmem>>, vector<1x32xf32>
    %cst_75 = arith.constant dense<0.000000e+00> : vector<8xf32>
    %277 = vector.multi_reduction <add>, %274, %cst_75 [1] : vector<8x32xf32> to vector<8xf32>
    %278 = vector.shape_cast %277 : vector<8xf32> to vector<8x1xf32>
    %cst_76 = arith.constant 3.200000e+01 : f32
    %279 = vector.broadcast %cst_76 : f32 to vector<8x1xf32>
    %280 = arith.divf %278, %279 : vector<8x1xf32>
    %281 = vector.broadcast %280 : vector<8x1xf32> to vector<8x32xf32>
    %282 = arith.subf %274, %281 : vector<8x32xf32>
    %283 = arith.mulf %282, %282 : vector<8x32xf32>
    %cst_77 = arith.constant dense<0.000000e+00> : vector<8xf32>
    %284 = vector.multi_reduction <add>, %283, %cst_77 [1] : vector<8x32xf32> to vector<8xf32>
    %285 = vector.shape_cast %284 : vector<8xf32> to vector<8x1xf32>
    %cst_78 = arith.constant 3.200000e+01 : f32
    %286 = vector.broadcast %cst_78 : f32 to vector<8x1xf32>
    %287 = arith.divf %285, %286 : vector<8x1xf32>
    %cst_79 = arith.constant 9.99999974E-6 : f32
    %288 = vector.broadcast %cst_79 : f32 to vector<8x1xf32>
    %289 = arith.addf %287, %288 : vector<8x1xf32>
    %290 = math.rsqrt %289 : vector<8x1xf32>
    %291 = vector.broadcast %290 : vector<8x1xf32> to vector<8x32xf32>
    %292 = arith.mulf %282, %291 : vector<8x32xf32>
    %293 = vector.broadcast %275 : vector<1x32xf32> to vector<8x32xf32>
    %294 = arith.mulf %292, %293 : vector<8x32xf32>
    %295 = vector.broadcast %276 : vector<1x32xf32> to vector<8x32xf32>
    %296 = arith.addf %294, %295 : vector<8x32xf32>
    %297 = vector.shape_cast %296 : vector<8x32xf32> to vector<1x8x32xf32>
    %c0_80 = arith.constant 0 : index
    %c0_81 = arith.constant 0 : index
    %c0_82 = arith.constant 0 : index
    %298 = vector.load %arg14[%c0_80, %c0_81, %c0_82] : memref<1x8x32xf32, #tpu.memory_space<vmem>>, vector<1x8x32xf32>
    tpu.vector_store %arg14[%c0_80, %c0_81, %c0_82], %297 {strides = array<i32>} : memref<1x8x32xf32, #tpu.memory_space<vmem>>, vector<1x8x32xf32>,
    return
  }
  func.func @transform_0(%arg0: i32) -> (i32, i32, i32) {
    %c0_i32 = arith.constant 0 : i32
    %c0_i32_0 = arith.constant 0 : i32
    %c0_i32_1 = arith.constant 0 : i32
    return %arg0, %c0_i32, %c0_i32_0 : i32, i32, i32
  }
  func.func @transform_1(%arg0: i32) -> (i32, i32) {
    %c0_i32 = arith.constant 0 : i32
    %c0_i32_0 = arith.constant 0 : i32
    %c0_i32_1 = arith.constant 0 : i32
    return %c0_i32, %c0_i32_0 : i32, i32
  }
  func.func @transform_2(%arg0: i32) -> (i32, i32) {
    %c0_i32 = arith.constant 0 : i32
    %c0_i32_0 = arith.constant 0 : i32
    %c0_i32_1 = arith.constant 0 : i32
    return %c0_i32, %c0_i32_0 : i32, i32
  }
  func.func @transform_3(%arg0: i32) -> (i32, i32) {
    %c0_i32 = arith.constant 0 : i32
    %c0_i32_0 = arith.constant 0 : i32
    %c0_i32_1 = arith.constant 0 : i32
    return %c0_i32, %c0_i32_0 : i32, i32
  }
  func.func @transform_4(%arg0: i32) -> (i32, i32) {
    %c0_i32 = arith.constant 0 : i32
    %c0_i32_0 = arith.constant 0 : i32
    %c0_i32_1 = arith.constant 0 : i32
    return %c0_i32, %c0_i32_0 : i32, i32
  }
  func.func @transform_5(%arg0: i32) -> (i32, i32) {
    %c0_i32 = arith.constant 0 : i32
    %c0_i32_0 = arith.constant 0 : i32
    %c0_i32_1 = arith.constant 0 : i32
    return %c0_i32, %c0_i32_0 : i32, i32
  }
  func.func @transform_6(%arg0: i32) -> (i32, i32) {
    %c0_i32 = arith.constant 0 : i32
    %c0_i32_0 = arith.constant 0 : i32
    %c0_i32_1 = arith.constant 0 : i32
    return %c0_i32, %c0_i32_0 : i32, i32
  }
  func.func @transform_7(%arg0: i32) -> (i32, i32) {
    %c0_i32 = arith.constant 0 : i32
    %c0_i32_0 = arith.constant 0 : i32
    %c0_i32_1 = arith.constant 0 : i32
    return %c0_i32, %c0_i32_0 : i32, i32
  }
  func.func @transform_8(%arg0: i32) -> (i32, i32) {
    %c0_i32 = arith.constant 0 : i32
    %c0_i32_0 = arith.constant 0 : i32
    %c0_i32_1 = arith.constant 0 : i32
    return %c0_i32, %c0_i32_0 : i32, i32
  }
  func.func @transform_9(%arg0: i32) -> (i32, i32) {
    %c0_i32 = arith.constant 0 : i32
    %c0_i32_0 = arith.constant 0 : i32
    %c0_i32_1 = arith.constant 0 : i32
    return %c0_i32, %c0_i32_0 : i32, i32
  }
  func.func @transform_10(%arg0: i32) -> (i32, i32) {
    %c0_i32 = arith.constant 0 : i32
    %c0_i32_0 = arith.constant 0 : i32
    %c0_i32_1 = arith.constant 0 : i32
    return %c0_i32, %c0_i32_0 : i32, i32
  }
  func.func @transform_11(%arg0: i32) -> (i32, i32) {
    %c0_i32 = arith.constant 0 : i32
    %c0_i32_0 = arith.constant 0 : i32
    %c0_i32_1 = arith.constant 0 : i32
    return %c0_i32, %c0_i32_0 : i32, i32
  }
  func.func @transform_12(%arg0: i32) -> (i32, i32) {
    %c0_i32 = arith.constant 0 : i32
    %c0_i32_0 = arith.constant 0 : i32
    %c0_i32_1 = arith.constant 0 : i32
    return %c0_i32, %c0_i32_0 : i32, i32
  }
  func.func @transform_13(%arg0: i32) -> (i32, i32, i32) {
    %c0_i32 = arith.constant 0 : i32
    %c0_i32_0 = arith.constant 0 : i32
    %c0_i32_1 = arith.constant 0 : i32
    return %arg0, %c0_i32, %c0_i32_0 : i32, i32, i32
  }
}

</mosaic_0001>

<bundles_post_ra>
// kernel: tpu_custom_call.1
= control target key start
LH: loop header
LB: loop body
LE: loop exit
PB: predicated region body
PF: predicated region fallthrough
CT: control target
= control target key end

     0   :  { %7 = vsyncpa [#allocation3], 0  ;;  %s635_s0 = inlined_call_operand.hbm [shape: f32[8,128], index: 0, kind: input, shape index: {}]   ;;  %s636_s1 = inlined_call_operand.hbm [shape: f32[16,128], index: 1, kind: input, shape index: {}]   ;;  %s637_s2 = inlined_call_operand.hbm [shape: f32[16,128], index: 2, kind: output, shape index: {}]  }
   0x1   :  { %8 = vsyncpa [#allocation6], 0 }
   0x2   :  { %10 = vsyncpa [#allocation6 + $0x1], 0 }
   0x3   :  { %11 = vsyncpa [#allocation4], 0 }
   0x4   :  { %13 = vsyncpa [#allocation4 + $0x1], 0  ;;  %s497_s9 = smov 0   ;;  %s499_s10 = smov 0  }
   0x5   :  { %s501_s11 = smov 0   ;;  %s503_s12 = smov 0  }
   0x6 LB: > { %s518_s13 = sadd.s32 4294967295, %s479_s12   ;;  %s278_s14 = sadd.s32 4294967294, %s479_s12   ;;  %s479_s12 = sphi %s503_s12, %s647_s12   ;;  %s475_s11 = sphi %s501_s11, %s646_s11   ;;  %s471_s10 = sphi %s499_s10, %s645_s10   ;;  %s467_s9 = sphi %s497_s9, %s644_s9  }
   0x7   : > { %p60_p0 = scmp.ne.s32.totalorder %s471_s10, %s467_s9  ;;  %p61_p1 = scmp.eq.s32.totalorder %s518_s13, 0 }
   0x8   : > { %p84_p2 = scmp.eq.s32.totalorder %s518_s13, 1  ;;  %p90_p3 = scmp.eq.s32.totalorder %s278_s14, 1 }
   0x9   : > { %p527_p4 = por %p61_p1, %p60_p0  ;;  %p279_p5 = scmp.ge.s32.totalorder %s479_s12, 1 }
   0xa   : > { %p532_p6 = por %p90_p3, %p60_p0  ;;  %p97_p7 = scmp.lt.s32.totalorder %s479_s12, 3 }
   0xb   : > { %s109_s19 = sshll.u32 %s635_s0, 4  ;;  %s481_s21 = smov [#allocation2]   ;;  %s110_s19 = int_to_ptr.hbm [resolvable:$true] %s109_s19 }
   0xc   : > { %p540_p8 = pnand %p279_p5, %p97_p7  ;;  %s111_s22 = sshll.u32 %s481_s21, 4  ;;  %s112_s22 = int_to_ptr.vmem [resolvable:$true] %s111_s22 }
   0xd   : > { %s550_s23 = sadd.s32 1, %s479_s12   ;;  %s47_s24 = sadd.s32 1, %s475_s11 }
   0xe   : > { %p300_p10 = pneg %p540_p8  ;;  %s44_s25 = ssub.s32 %s479_s12, %s550_s23 }
   0xf   : > { %p45_p12 = scmp.eq.s32.totalorder %s44_s25, 0  ;;  %p54_p13 = scmp.ne.s32.totalorder %s475_s11, %s471_s10 }
  0x10   : > { %p301_p11 = pnand %p300_p10, %p61_p1  ;;  %p55_p0 = scmp.eq.s32.totalorder %s479_s12, 0 }
  0x11   : > { %s559_s26 = scalar_select %p45_p12, %s475_s11, %s47_s24  }
  0x12   : > { %303 = dma.hbm_to_vmem [thread:$0]  (!%p301_p11), %s110_s19, 128, %s112_s22, [#allocation3]  }
  0x13   : > { %p563_p3 = por %p84_p2, %p54_p13  ;;  %p313_p5 = scmp.lt.s32.totalorder %s479_s12, 2 }
  0x14   : > { %s122_s28 = sand.u32 1, %s475_s11   ;;  %s283_s29 = sshll.u32 %s479_s12, 3 }
  0x15   : > { %p56_p7 = por %p55_p0, %p54_p13  ;;  %s282_s30 = sshll.u32 %s122_s28, 3 }
  0x16   : > { %s130_s5 = scalar_lea.hbm %s636_s1, %s283_s29  ;;  %s126_s7 = scalar_lea.vmem [#allocation5], %s282_s30 }
  0x17   : > { %s132_s6 = sshll.u32 %s130_s5, 4  ;;  %s134_s8 = sshll.u32 %s126_s7, 4  ;;  %s133_s6 = int_to_ptr.hbm [resolvable:$true] %s132_s6  ;;  %s135_s8 = int_to_ptr.vmem [resolvable:$true] %s134_s8 }
  0x18   : > { %p573_p10 = pnand %p313_p5, %p56_p7  ;;  %s123_s17 = scalar_lea.sflag [#allocation6], %s122_s28 }
  0x19   : > { %s379_s18 = sshra.s32 %s133_s6, 4  ;;  %s386_s24 = scalar_lea.hbm %s636_s1, 16  ;;  %s380_s18 = int_to_ptr.hbm [resolvable:$true] %s379_s18 }
  0x1a   : > { %s381_s19 = scalar_lea.hbm %s380_s18, 8  ;;  %p383_p11 = pneg %p573_p10 }
  0x1b   : > { %p382_p2 = scmp.ne.s32.totalorder %s380_s18, %s381_s19  ;;  %p387_p0 = scmp.lt.s32.totalorder %s380_s18, %s636_s1 }
  0x1c   : > { %p388_p5 = scmp.lt.s32.totalorder %s386_s24, %s381_s19 }
  0x1d   : > { %p384_p12 = pnand %p383_p11, %p382_p2 }
  0x1e   : > { %p389_p7 = por %p388_p5, %p387_p0 }
  0x1f   : > { %p385_p13 = pneg %p384_p12 }
  0x21   : > { %p390_p9 = pnand %p389_p7, %p385_p13 }
  0x23   : > { %393 = shalt.err (!%p390_p9)
}
  0x24   : > { %307 = dma.hbm_to_vmem [thread:$0]  (!%p573_p10), %s133_s6, 128, %s135_s8, %s123_s17  }
  0x25   : > { %143 = sbr.rel (%p540_p8) target bundleno = 62 (0x3e), region = 28 }
  0x2a   : > { %454 = dma.done.wait (%p61_p1), [#allocation3], 128  }
  0x2b   : > { %456 = vsyncadd (%p61_p1), [#allocation3], 4294967168  ;;  %s594_s28 = sand.u32 1, %s471_s10  }
  0x2c   : > { %s286_s30 = sshll.u32 %s594_s28, 3  ;;  %s151_s3 = scalar_lea.sflag [#allocation6], %s594_s28 }
  0x2d   : > { %s154_s4 = scalar_lea.vmem [#allocation5], %s286_s30 }
  0x2e   : > { %458 = dma.done.wait (%p527_p4), %s151_s3, 128  }
  0x2f   : > { %460 = vsyncadd (%p527_p4), %s151_s3, 4294967168  ;;  %s289_s20 = sshll.u32 %s518_s13, 3  ;;  %s175_s8 = scalar_lea.vmem [#allocation7], %s286_s30  ;;  %v176_v0 = vld [vmem:[%s154_s4] sm:$0xff]  ;;  %v177_v1 = vld [vmem:[#allocation2] sm:$0xff] }
  0x30   : > { %s191_s7 = scalar_lea.hbm %s637_s2, %s289_s20  ;;  %s193_s14 = sshll.u32 %s175_s8, 4  ;;  %v178_v2 = vadd.f32 %v177_v1, %v176_v0  ;;  %s194_s14 = int_to_ptr.vmem [resolvable:$true] %s193_s14 }
  0x31   : > { %s195_s17 = sshll.u32 %s191_s7, 4  ;;  %s181_s18 = scalar_lea.sflag [#allocation4], %s594_s28  ;;  %s196_s17 = int_to_ptr.hbm [resolvable:$true] %s195_s17 }
  0x32   : > { %179 = vst [vmem:[%s175_s8] sm:$0xff] %v178_v2  ;;  %s423_s15 = sshra.s32 %s196_s17, 4  ;;  %s429_s22 = scalar_lea.hbm %s637_s2, 16  ;;  %s424_s15 = int_to_ptr.hbm [resolvable:$true] %s423_s15 }
  0x33   : > { %s425_s19 = scalar_lea.hbm %s424_s15, 8  ;;  %p430_p9 = scmp.lt.s32.totalorder %s424_s15, %s637_s2 }
  0x34   : > { %p426_p1 = scmp.ne.s32.totalorder %s424_s15, %s425_s19  ;;  %p431_p10 = scmp.lt.s32.totalorder %s429_s22, %s425_s19 }
  0x36   : > { %p427_p4 = pnand %p426_p1, %p563_p3  ;;  %p432_p2 = por %p431_p10, %p430_p9 }
  0x38   : > { %p428_p8 = pneg %p427_p4 }
  0x3a   : > { %p433_p11 = pnand %p432_p2, %p428_p8 }
  0x3c   : > { %436 = shalt.err (!%p433_p11)
}
  0x3d   : > { %298 = dma.vmem_to_hbm [thread:$0]  (%p563_p3), %s194_s14, 128, %s196_s17, %s181_s18  }
  0x3e PF: > { %s207_s29 = sand.u32 1, %s467_s9   ;;  %p643_p12 = scmp.ge.s32.totalorder %s479_s12, 2 }
  0x3f   : > { %s208_s28 = scalar_lea.sflag [#allocation4], %s207_s29 }
  0x40   : > { %p309_p13 = pnand %p643_p12, %p532_p6 }
  0x42   : > { %p310_p0 = pneg %p309_p13 }
  0x44   : > { %462 = dma.done.wait (%p310_p0), %s208_s28, 128  }
  0x45   : > { %464 = vsyncadd (%p310_p0), %s208_s28, 4294967168  ;;  %p16_p5 = scmp.ge.s32.totalorder %s550_s23, 4   ;;  %s644_s9 = smov %s471_s10 }
  0x46   : > { %s645_s10 = smov %s475_s11  ;;  %s646_s11 = smov %s559_s26 }
  0x47   : > { %s647_s12 = smov %s550_s23  ;;  %18 = sbr.rel (!%p16_p5) target bundleno = 6 (0x6), region = 78 }
  0x4c   :  { %214 = vsyncpa [#allocation3], 1 }
  0x4d   :  { %216 = vsyncpa [#allocation3 + $0x1], 1 }
  0x4e   :  { %217 = vsyncpa [#allocation6], 1 }
  0x4f   :  { %219 = vsyncpa [#allocation6 + $0x1], 1 }
  0x50   :  { %220 = vsyncpa [#allocation4], 1 }
  0x51   :  { %222 = vsyncpa [#allocation4 + $0x1], 1 }

// kernel: transformer_expert.2
= control target key start
LH: loop header
LB: loop body
LE: loop exit
PB: predicated region body
PF: predicated region fallthrough
CT: control target
= control target key end

     0   :  { %s1710_s25 = smov 0   ;;  %s1904_s0 = inlined_call_operand.vmem [shape: f32[2,8,32], index: 0, kind: input, shape index: {}]   ;;  %s1905_s1 = inlined_call_operand.vmem [shape: bf16[32,96], index: 1, kind: input, shape index: {}]   ;;  %s1906_s2 = inlined_call_operand.vmem [shape: f32[1,96], index: 2, kind: input, shape index: {}]   ;;  %s1907_s3 = inlined_call_operand.vmem [shape: bf16[32,32], index: 3, kind: input, shape index: {}]   ;;  %s1908_s4 = inlined_call_operand.vmem [shape: f32[1,32], index: 4, kind: input, shape index: {}]   ;;  %s1909_s5 = inlined_call_operand.vmem [shape: f32[1,32], index: 5, kind: input, shape index: {}]   ;;  %s1910_s6 = inlined_call_operand.vmem [shape: f32[1,32], index: 6, kind: input, shape index: {}]   ;;  %s1911_s7 = inlined_call_operand.vmem [shape: bf16[32,64], index: 7, kind: input, shape index: {}]   ;;  %s1912_s8 = inlined_call_operand.vmem [shape: f32[1,64], index: 8, kind: input, shape index: {}]   ;;  %s1913_s9 = inlined_call_operand.vmem [shape: bf16[64,32], index: 9, kind: input, shape index: {}]   ;;  %s1914_s10 = inlined_call_operand.vmem [shape: f32[1,32], index: 10, kind: input, shape index: {}]   ;;  %s1915_s11 = inlined_call_operand.vmem [shape: f32[1,32], index: 11, kind: input, shape index: {}]   ;;  %s1916_s12 = inlined_call_operand.vmem [shape: f32[1,32], index: 12, kind: input, shape index: {}]   ;;  %s1917_s13 = inlined_call_operand.vmem [shape: f32[2,8,32], index: 13, kind: output, shape index: {}]  }
   0x1 LB: > { %s1454_s26 = sadd.s32 4294967295, %s1614_s25   ;;  %p1458_p0 = scmp.ge.s32.totalorder %s1614_s25, 1  ;;  %s1614_s25 = sphi %s1710_s25, %s23_s25  }
   0x2   : > { %p386_p1 = scmp.lt.s32.totalorder %s1614_s25, 3 }
   0x4   : > { %p387_p2 = pnand %p1458_p0, %p386_p1 }
   0x5   : > { %p428_p3 = scmp.lt.s32.totalorder (!%p387_p2), %s1454_s26, 1  ;;  %s1616_s20 = smov (!%p387_p2), 124  }
   0x6   : > { %390 = sbr.rel (%p387_p2) target bundleno = 3136 (0xc40), region = 72  ;;  %s1617_s21 = smov (!%p387_p2), 64  }
   0x7   : > { %s1618_s22 = smov (!%p387_p2), 96   ;;  %s1619_s23 = smov (!%p387_p2), 92  }
   0x8   : > { %s1620_s24 = smov (!%p387_p2), 88   ;;  %s1621_s27 = smov (!%p387_p2), 60  }
   0x9   : > { %s1622_s28 = smov (!%p387_p2), 84   ;;  %s1623_s15 = smov (!%p387_p2), 120  }
   0xa   : > { %s1624_s16 = smov (!%p387_p2), 116   ;;  %s1626_s18 = smov (!%p387_p2), 52  }
   0xb   : > { %v1523_v0 = vld [vmem:[%s1905_s1 + $0x8] sm:$0xff]  ;;  %v1522_v1 = vld [vmem:[%s1905_s1] sm:$0xff]  ;;  %s1919_s26 = smov (!%p428_p3, %s1454_s26), 1  ;;  %vm459_vm0 = vcmask 261120   ;;  %vm528_vm1 = vcmask 1043456   ;;  %vm491_vm2 = vcmask 31744  }
   0xc   : > { %469 = vmatpush.bf16.msra.mxu0 %v1523_v0  ;;  %s1459_s14 = sshll.u32 %s1919_s26, 3  ;;  %v1562_v4 = vld [vmem:[%s1906_s2] ss:$0 sm:$0xff]  ;;  %vm511_vm3 = vcmask 64512   ;;  %vm564_vm4 = vcmask 1041408   ;;  %s1632_s30 = smov 76  }
   0xd   : > { %s431_s17 = scalar_lea.vmem %s1904_s0, %s1459_s14  ;;  %v476_v30 = vld [vmem:[%s1907_s3] sm:$0xf]  ;;  %s1637_s19 = smov 100  }
   0xe   : > { %v1732_v2 = vld [vmem:[%s431_s17] sm:$0xff]  ;;  %v566_v31 = vsel %vm564_vm4, %v476_v30, 0  ;;  %v654_v32 = vunpack.c.l.b16 %v476_v30  ;;  %s1625_s17 = smov 56  }
   0xf   : > { %v438_v3 = vpack.c.bf16 %v1732_v2, %v1732_v2  ;;  %575 = vmatpush.bf16.msra.mxu3 %v566_v31 }
  0x10   : > { %470 = vmatpush.bf16.msra.mxu0 %v1522_v1  ;;  %v655_v33 = vpack.c.b16 %v654_v32, %v654_v32  ;;  %v1563_v32 = vld [vmem:[%s1908_s4] ss:$0 sm:$0xff] }
  0x12   : > { %v656_v34 = vrot.slane %v655_v33, 2 }
  0x13   : > { %1469 = vmatmul.msk.bf16.vlgmr.msra.gmra.mxu0 %vm459_vm0, %v438_v3 }
  0x14   : > { %v661_v35 = vsel %vm564_vm4, %v656_v34, 0 }
  0x15   : > { %670 = vmatpush.bf16.msrb.mxu0 %v661_v35 }
  0x90   : > { %v472_v5 = vpop.f32.mrf.mxu0 }
  0x91   : > { %v473_v6 = vadd.f32 %v1562_v4, %v472_v5 }
  0x93   : > { %v485_v7 = vpack.c.bf16 %v473_v6, %v473_v6 }
  0x95   : > { %v487_v8 = vunpack.c.l.b16 %v485_v7 }
  0x97   : > { %v1740_v9 = vpack.c.b16 %v487_v8, %v487_v8 }
  0x98   : > { %v474_v10 = vpop.f32.mrf.mxu0 }
  0x99   : > { %582 = vrot.lane.b32.xlu2 %v1740_v9, %s1616_s20  ;;  %523 = vrot.lane.b32.xlu1 %v1740_v9, %s1617_s21  ;;  %s1627_s21 = smov 112  }
  0x9a   : > { %489 = vrot.lane.b32.xlu0 %v1740_v9, %s1618_s22  ;;  %s1628_s22 = smov 48  }
  0xa1   : > { %584 = vrot.lane.b32.xlu1 %v1740_v9, %s1619_s23  ;;  %s1629_s23 = smov 44  }
  0xf3   : > { %v583_v29 = vpop.permute.xlu2 %582 }
 0x10b   : > { %v524_v11 = vpop.permute.xlu1 %523 }
 0x10c   : > { %v490_v12 = vpop.permute.xlu0 %489  ;;  %v530_v13 = vsel %vm528_vm1, %v524_v11, 0 }
 0x10d   : > { %v496_v14 = vsel %vm491_vm2, %v490_v12, 0  ;;  %539 = vmatpush.bf16.msra.mxu2 %v530_v13 }
 0x10e   : > { %505 = vmatpush.bf16.xpose.msra.mxu1 %v496_v14 }
 0x113   : > { %v585_v15 = vpop.permute.xlu1 %584 }
 0x114   : > { %v590_v16 = vsel %vm491_vm2, %v585_v15, 0 }
 0x115   : > { %1470 = vmatmul.msk.bf16.vlgmr.msra.gmra.mxu1 %vm491_vm2, %v485_v7  ;;  %599 = vmatpush.bf16.xpose.msrb.mxu2 %v590_v16 }
 0x192   : > { %v507_v17 = vpop.f32.mrf.mxu1 }
 0x193   : > { %v512_v18 = vsel %vm511_vm3, %v507_v17, -inf }
 0x194   : > { %513 = vmax.xlane.f32.xlu0 %v512_v18 }
 0x19a   : > { %v509_v19 = vpop.f32.mrf.mxu1 }
 0x1a8   : > { %679 = vrot.lane.b32.xlu0 %v1740_v9, %s1620_s24  ;;  %s1630_s24 = smov 80  }
 0x207   : > { %v514_v20 = vpop.xlane.xlu0 %513 }
 0x208   : > { %v515_v21 = vsub.f32 %v507_v17, %v514_v20 }
 0x20a   : > { %v516_v22 = vmul.f32 1.442695, %v515_v21 }
 0x20c   : > { %1570 = vpow2.f32 %v516_v22 }
 0x212   : > { %v1571_v23 = vpop.eup %1570 }
 0x213   : > { %v518_v24 = vpack.c.bf16 %v1571_v23, %v1571_v23 }
 0x215   : > { %1471 = vmatmul.msk.bf16.vlgmr.msra.gmra.mxu2 %vm511_vm3, %v518_v24  ;;  %v519_v25 = vunpack.c.l.bf16 %v518_v24 }
 0x217   : > { %v520_v26 = vsel %vm511_vm3, %v519_v25, 0.0 }
 0x218   : > { %521 = vadd.xlane.f32.xlu2 %v520_v26 }
 0x21a   : > { %v680_v27 = vpop.permute.xlu0 %679 }
 0x21b   : > { %v685_v28 = vsel %vm491_vm2, %v680_v27, 0 }
 0x21c   : > { %694 = vmatpush.bf16.xpose.msrb.mxu1 %v685_v28 }
 0x225   : > { %1473 = vmatmul.msk.bf16.vlgmr.msrb.gmra.mxu2 %vm491_vm2, %v583_v29 }
 0x230   : > { %616 = vrot.lane.b32.xlu2 %v1740_v9, %s1621_s27  ;;  %s1631_s27 = smov 108  }
 0x238   : > { %770 = vrot.lane.b32.xlu2 %v1740_v9, %s1622_s28 }
 0x28b   : > { %v522_v36 = vpop.xlane.xlu2 %521 }
 0x28c   : > { %1572 = vrcp.f32 %v522_v36  ;;  %v556_v42 = vand.u32 2147483648, %v522_v36  ;;  %v554_v44 = vand.u32 2147483647, %v522_v36  ;;  %vm550_vm6 = vweird.f32 %v522_v36 }
 0x28e   : > { %v557_v47 = vor.u32 1.1754944e-38, %v556_v42  ;;  %vm555_vm8 = vcmp.eq.f32.partialorder %v554_v44, 8.507059e+37  ;;  %v477_v44 = vld [vmem:[%s1907_s3 + $0x4] sm:$0xf] }
 0x292   : > { %v1573_v37 = vpop.eup %1572 }
 0x293   : > { %v546_v38 = vmul.f32 %v1573_v37, %v522_v36  ;;  %v617_v39 = vpop.permute.xlu2 %616  ;;  %vm551_vm5 = vweird.f32 %v1573_v37 }
 0x294   : > { %v622_v40 = vsel %vm528_vm1, %v617_v39, 0  ;;  %vm552_vm7 = vmor %vm550_vm6, %vm551_vm5 }
 0x295   : > { %v547_v41 = vsub.f32 1.0, %v546_v38  ;;  %631 = vmatpush.bf16.msrb.mxu3 %v622_v40 }
 0x297   : > { %v548_v43 = vmul.f32 %v1573_v37, %v547_v41 }
 0x298   : > { %v541_v45 = vpop.f32.mrf.mxu2 }
 0x299   : > { %v549_v46 = vadd.f32 %v1573_v37, %v548_v43 }
 0x29b   : > { %v553_v48 = vsel %vm552_vm7, %v1573_v37, %v549_v46  ;;  %v771_v49 = vpop.permute.xlu2 %770 }
 0x29c   : > { %v558_v50 = vsel %vm555_vm8, %v557_v47, %v553_v48  ;;  %v776_v51 = vsel %vm491_vm2, %v771_v49, 0 }
 0x29d   : > { %v559_v52 = vmul.f32 %v558_v50, %v541_v45  ;;  %785 = vmatpush.bf16.xpose.msra.mxu0 %v776_v51  ;;  %v752_v45 = vsel %vm564_vm4, %v477_v44, 0 }
 0x29f   : > { %v560_v53 = vpack.c.bf16 %v559_v52, %v559_v52 }
 0x2a0   : > { %v543_v54 = vpop.f32.mrf.mxu2 }
 0x2a1   : > { %1472 = vmatmul.msk.bf16.vlgmr.msra.gmra.mxu3 %vm491_vm2, %v560_v53 }
 0x2a2   : > { %761 = vmatpush.bf16.msra.mxu3 %v752_v45 }
 0x2a8   : > { %v601_v55 = vpop.f32.mrf.mxu2 }
 0x2a9   : > { %v605_v56 = vsel %vm511_vm3, %v601_v55, -inf }
 0x2aa   : > { %606 = vmax.xlane.f32.xlu1 %v605_v56 }
 0x2b0   : > { %v603_v57 = vpop.f32.mrf.mxu2 }
 0x2c3   : > { %677 = vrot.lane.b32.xlu1 %v1740_v9, %s1623_s15  ;;  %s1633_s15 = smov 68  }
 0x31d   : > { %v607_v58 = vpop.xlane.xlu1 %606 }
 0x31e   : > { %v608_v59 = vsub.f32 %v601_v55, %v607_v58 }
 0x320   : > { %v609_v60 = vmul.f32 1.442695, %v608_v59 }
 0x322   : > { %1574 = vpow2.f32 %v609_v60 }
 0x324   : > { %v577_v61 = vpop.f32.mrf.mxu3 }
 0x325   : > { %v581_v34 = vadd.f32 %v1563_v32, %v577_v61 }
 0x328   : > { %v1575_v62 = vpop.eup %1574 }
 0x329   : > { %v611_v63 = vpack.c.bf16 %v1575_v62, %v1575_v62 }
 0x32b   : > { %1474 = vmatmul.msk.bf16.vlgmr.msrb.gmra.mxu3 %vm511_vm3, %v611_v63  ;;  %v612_v0 = vunpack.c.l.bf16 %v611_v63 }
 0x32c   : > { %v579_v1 = vpop.f32.mrf.mxu3 }
 0x32d   : > { %v613_v3 = vsel %vm511_vm3, %v612_v0, 0.0 }
 0x32e   : > { %614 = vadd.xlane.f32.xlu0 %v613_v3 }
 0x335   : > { %v678_v4 = vpop.permute.xlu1 %677 }
 0x336   : > { %1476 = vmatmul.msk.bf16.vlgmr.msrb.gmra.mxu1 %vm491_vm2, %v678_v4 }
 0x342   : > { %768 = vrot.lane.b32.xlu0 %v1740_v9, %s1624_s16  ;;  %s1634_s16 = smov 40  }
 0x34a   : > { %711 = vrot.lane.b32.xlu0 %v1740_v9, %s1625_s17  ;;  %s1635_s17 = smov 72  }
 0x352   : > { %802 = vrot.lane.b32.xlu0 %v1740_v9, %s1626_s18  ;;  %s1636_s18 = smov 36  }
 0x3a1   : > { %v615_v5 = vpop.xlane.xlu0 %614 }
 0x3a2   : > { %1576 = vrcp.f32 %v615_v5  ;;  %v648_v10 = vand.u32 2147483648, %v615_v5  ;;  %v646_v12 = vand.u32 2147483647, %v615_v5  ;;  %vm642_vm10 = vweird.f32 %v615_v5 }
 0x3a4   : > { %v649_v15 = vor.u32 1.1754944e-38, %v648_v10  ;;  %vm647_vm12 = vcmp.eq.f32.partialorder %v646_v12, 8.507059e+37 }
 0x3a8   : > { %v1577_v6 = vpop.eup %1576 }
 0x3a9   : > { %v638_v7 = vmul.f32 %v1577_v6, %v615_v5  ;;  %vm643_vm9 = vweird.f32 %v1577_v6 }
 0x3aa   : > { %vm644_vm11 = vmor %vm642_vm10, %vm643_vm9 }
 0x3ab   : > { %v639_v8 = vsub.f32 1.0, %v638_v7 }
 0x3ad   : > { %v640_v11 = vmul.f32 %v1577_v6, %v639_v8 }
 0x3ae   : > { %v633_v13 = vpop.f32.mrf.mxu3 }
 0x3af   : > { %v641_v14 = vadd.f32 %v1577_v6, %v640_v11 }
 0x3b1   : > { %v645_v16 = vsel %vm644_vm11, %v1577_v6, %v641_v14 }
 0x3b2   : > { %v650_v17 = vsel %vm647_vm12, %v649_v15, %v645_v16 }
 0x3b3   : > { %v651_v18 = vmul.f32 %v650_v17, %v633_v13  ;;  %v696_v19 = vpop.f32.mrf.mxu1  ;;  %v840_v13 = vunpack.c.l.b16 %v477_v44 }
 0x3b4   : > { %v769_v20 = vpop.permute.xlu0 %768  ;;  %v700_v21 = vsel %vm511_vm3, %v696_v19, -inf }
 0x3b5   : > { %v652_v22 = vpack.c.bf16 %v651_v18, %v651_v18  ;;  %701 = vmax.xlane.f32.xlu2 %v700_v21  ;;  %v841_v14 = vpack.c.b16 %v840_v13, %v840_v13 }
 0x3b6   : > { %v635_v23 = vpop.f32.mrf.mxu3 }
 0x3b7   : > { %1475 = vmatmul.msk.bf16.vlgmr.msrb.gmra.mxu0 %vm491_vm2, %v652_v22  ;;  %v842_v15 = vrot.slane %v841_v14, 2 }
 0x3b9   : > { %v847_v16 = vsel %vm564_vm4, %v842_v15, 0 }
 0x3bb   : > { %v698_v24 = vpop.f32.mrf.mxu1 }
 0x3bc   : > { %v712_v25 = vpop.permute.xlu0 %711 }
 0x3bd   : > { %v717_v26 = vsel %vm528_vm1, %v712_v25, 0 }
 0x3be   : > { %726 = vmatpush.bf16.msra.mxu2 %v717_v26 }
 0x3c2   : > { %856 = vmatpush.bf16.msrb.mxu2 %v847_v16 }
 0x3c4   : > { %v803_v27 = vpop.permute.xlu0 %802 }
 0x3c5   : > { %v808_v28 = vsel %vm528_vm1, %v803_v27, 0 }
 0x3c6   : > { %817 = vmatpush.bf16.msra.mxu1 %v808_v28 }
 0x3c7   : > { %1479 = vmatmul.msk.bf16.vlgmr.msra.gmra.mxu0 %vm491_vm2, %v769_v20 }
 0x428   : > { %v702_v29 = vpop.xlane.xlu2 %701 }
 0x429   : > { %v703_v30 = vsub.f32 %v696_v19, %v702_v29 }
 0x42b   : > { %v704_v31 = vmul.f32 1.442695, %v703_v30 }
 0x42d   : > { %1578 = vpow2.f32 %v704_v31 }
 0x433   : > { %v1579_v33 = vpop.eup %1578 }
 0x434   : > { %v706_v35 = vpack.c.bf16 %v1579_v33, %v1579_v33  ;;  %v672_v36 = vpop.f32.mrf.mxu0 }
 0x435   : > { %v1782_v37 = vadd.f32 %v672_v36, %v581_v34 }
 0x436   : > { %1477 = vmatmul.msk.bf16.vlgmr.msra.gmra.mxu2 %vm511_vm3, %v706_v35  ;;  %v707_v38 = vunpack.c.l.bf16 %v706_v35 }
 0x438   : > { %v708_v39 = vsel %vm511_vm3, %v707_v38, 0.0 }
 0x439   : > { %709 = vadd.xlane.f32.xlu0 %v708_v39 }
 0x43c   : > { %v674_v40 = vpop.f32.mrf.mxu0 }
 0x444   : > { %v787_v41 = vpop.f32.mrf.mxu0 }
 0x445   : > { %v791_v42 = vsel %vm511_vm3, %v787_v41, -inf }
 0x446   : > { %792 = vmax.xlane.f32.xlu1 %v791_v42 }
 0x44c   : > { %v789_v43 = vpop.f32.mrf.mxu0 }
 0x44d   : > { %863 = vrot.lane.b32.xlu0 %v1740_v9, %s1627_s21 }
 0x455   : > { %897 = vrot.lane.b32.xlu0 %v1740_v9, %s1628_s22  ;;  %s1638_s22 = smov 104  }
 0x45d   : > { %988 = vrot.lane.b32.xlu0 %v1740_v9, %s1629_s23  ;;  %s435_s23 = scalar_lea.vmem %s1917_s13, %s1459_s14 }
 0x45f   : > { %865 = vrot.lane.b32.xlu1 %v1740_v9, %s1630_s24 }
 0x467   : > { %954 = vrot.lane.b32.xlu1 %v1740_v9, %s1631_s27 }
 0x4ac   : > { %v710_v46 = vpop.xlane.xlu0 %709 }
 0x4ad   : > { %1580 = vrcp.f32 %v710_v46  ;;  %v743_v50 = vand.u32 2147483648, %v710_v46  ;;  %v741_v52 = vand.u32 2147483647, %v710_v46  ;;  %vm737_vm14 = vweird.f32 %v710_v46 }
 0x4af   : > { %v744_v57 = vor.u32 1.1754944e-38, %v743_v50  ;;  %vm742_vm5 = vcmp.eq.f32.partialorder %v741_v52, 8.507059e+37 }
 0x4b3   : > { %v1581_v47 = vpop.eup %1580 }
 0x4b4   : > { %v733_v48 = vmul.f32 %v1581_v47, %v710_v46  ;;  %vm738_vm13 = vweird.f32 %v1581_v47 }
 0x4b5   : > { %vm739_vm15 = vmor %vm737_vm14, %vm738_vm13 }
 0x4b6   : > { %v734_v49 = vsub.f32 1.0, %v733_v48 }
 0x4b8   : > { %v735_v51 = vmul.f32 %v1581_v47, %v734_v49 }
 0x4b9   : > { %v793_v53 = vpop.xlane.xlu1 %792  ;;  %v728_v54 = vpop.f32.mrf.mxu2 }
 0x4ba   : > { %v794_v55 = vsub.f32 %v787_v41, %v793_v53  ;;  %v736_v56 = vadd.f32 %v1581_v47, %v735_v51 }
 0x4bc   : > { %v795_v58 = vmul.f32 1.442695, %v794_v55  ;;  %v740_v59 = vsel %vm739_vm15, %v1581_v47, %v736_v56 }
 0x4bd   : > { %v745_v60 = vsel %vm742_vm5, %v744_v57, %v740_v59 }
 0x4be   : > { %1582 = vpow2.f32 %v795_v58  ;;  %v746_v61 = vmul.f32 %v745_v60, %v728_v54  ;;  %v478_v54 = vld [vmem:[%s1907_s3 + $0x8] sm:$0xf] }
 0x4bf   : > { %v864_v62 = vpop.permute.xlu0 %863  ;;  %v1026_v55 = vunpack.c.l.b16 %v478_v54  ;;  %v938_v58 = vsel %vm564_vm4, %v478_v54, 0 }
 0x4c0   : > { %v747_v63 = vpack.c.bf16 %v746_v61, %v746_v61  ;;  %947 = vmatpush.bf16.msrb.mxu1 %v938_v58 }
 0x4c1   : > { %v730_v0 = vpop.f32.mrf.mxu2  ;;  %v1027_v56 = vpack.c.b16 %v1026_v55, %v1026_v55 }
 0x4c2   : > { %1478 = vmatmul.msk.bf16.vlgmr.msra.gmra.mxu3 %vm491_vm2, %v747_v63 }
 0x4c3   : > { %v1028_v57 = vrot.slane %v1027_v56, 2 }
 0x4c4   : > { %v1583_v1 = vpop.eup %1582 }
 0x4c5   : > { %v797_v3 = vpack.c.bf16 %v1583_v1, %v1583_v1  ;;  %v1033_v59 = vsel %vm564_vm4, %v1028_v57, 0 }
 0x4c7   : > { %1480 = vmatmul.msk.bf16.vlgmr.msra.gmra.mxu1 %vm511_vm3, %v797_v3  ;;  %v898_v4 = vpop.permute.xlu0 %897  ;;  %v798_v5 = vunpack.c.l.bf16 %v797_v3 }
 0x4c8   : > { %v903_v6 = vsel %vm528_vm1, %v898_v4, 0 }
 0x4c9   : > { %912 = vmatpush.bf16.msrb.mxu0 %v903_v6  ;;  %v799_v7 = vsel %vm511_vm3, %v798_v5, 0.0 }
 0x4ca   : > { %800 = vadd.xlane.f32.xlu2 %v799_v7 }
 0x4cd   : > { %1042 = vmatpush.bf16.msra.mxu0 %v1033_v59 }
 0x4cf   : > { %v989_v8 = vpop.permute.xlu0 %988 }
 0x4d0   : > { %v994_v12 = vsel %vm528_vm1, %v989_v8, 0 }
 0x4d1   : > { %v866_v10 = vpop.permute.xlu1 %865 }
 0x4d2   : > { %v871_v11 = vsel %vm491_vm2, %v866_v10, 0 }
 0x4d3   : > { %880 = vmatpush.bf16.xpose.msrb.mxu3 %v871_v11 }
 0x4d9   : > { %v955_v39 = vpop.permute.xlu1 %954 }
 0x4da   : > { %1482 = vmatmul.msk.bf16.vlgmr.msrb.gmra.mxu3 %vm491_vm2, %v864_v62 }
 0x4db   : > { %1003 = vmatpush.bf16.msra.mxu3 %v994_v12 }
 0x4e2   : > { %956 = vrot.lane.b32.xlu2 %v1740_v9, %s1632_s30 }
 0x53d   : > { %v801_v17 = vpop.xlane.xlu2 %800 }
 0x53e   : > { %1584 = vrcp.f32 %v801_v17  ;;  %v834_v26 = vand.u32 2147483648, %v801_v17  ;;  %v832_v28 = vand.u32 2147483647, %v801_v17  ;;  %vm828_vm7 = vweird.f32 %v801_v17 }
 0x540   : > { %v835_v30 = vor.u32 1.1754944e-38, %v834_v26  ;;  %vm833_vm9 = vcmp.eq.f32.partialorder %v832_v28, 8.507059e+37 }
 0x544   : > { %v1585_v18 = vpop.eup %1584  ;;  %v819_v19 = vpop.f32.mrf.mxu1 }
 0x545   : > { %v824_v20 = vmul.f32 %v1585_v18, %v801_v17  ;;  %v763_v21 = vpop.f32.mrf.mxu3  ;;  %v957_v22 = vpop.permute.xlu2 %956  ;;  %vm829_vm6 = vweird.f32 %v1585_v18 }
 0x546   : > { %v767_v23 = vadd.f32 %v763_v21, %v1782_v37  ;;  %v962_v24 = vsel %vm491_vm2, %v957_v22, 0  ;;  %vm830_vm8 = vmor %vm828_vm7, %vm829_vm6 }
 0x547   : > { %v825_v25 = vsub.f32 1.0, %v824_v20  ;;  %971 = vmatpush.bf16.xpose.msra.mxu2 %v962_v24 }
 0x549   : > { %v826_v27 = vmul.f32 %v1585_v18, %v825_v25 }
 0x54b   : > { %v827_v29 = vadd.f32 %v1585_v18, %v826_v27 }
 0x54c   : > { %v821_v31 = vpop.f32.mrf.mxu1 }
 0x54d   : > { %v831_v32 = vsel %vm830_vm8, %v1585_v18, %v827_v29  ;;  %v765_v33 = vpop.f32.mrf.mxu3 }
 0x54e   : > { %v836_v34 = vsel %vm833_vm9, %v835_v30, %v831_v32 }
 0x54f   : > { %v837_v35 = vmul.f32 %v836_v34, %v819_v19 }
 0x551   : > { %v838_v36 = vpack.c.bf16 %v837_v35, %v837_v35 }
 0x553   : > { %1481 = vmatmul.msk.bf16.vlgmr.msrb.gmra.mxu2 %vm491_vm2, %v838_v36 }
 0x55d   : > { %v882_v37 = vpop.f32.mrf.mxu3 }
 0x55e   : > { %v886_v38 = vsel %vm511_vm3, %v882_v37, -inf }
 0x55f   : > { %887 = vmax.xlane.f32.xlu2 %v886_v38 }
 0x563   : > { %1485 = vmatmul.msk.bf16.vlgmr.msra.gmra.mxu2 %vm491_vm2, %v955_v39 }
 0x565   : > { %v884_v40 = vpop.f32.mrf.mxu3 }
 0x5d2   : > { %v888_v41 = vpop.xlane.xlu2 %887 }
 0x5d3   : > { %v889_v42 = vsub.f32 %v882_v37, %v888_v41 }
 0x5d5   : > { %v890_v43 = vmul.f32 1.442695, %v889_v42 }
 0x5d6   : > { %v858_v44 = vpop.f32.mrf.mxu2 }
 0x5d7   : > { %1586 = vpow2.f32 %v890_v43  ;;  %v1810_v45 = vadd.f32 %v858_v44, %v767_v23 }
 0x5dd   : > { %v1587_v46 = vpop.eup %1586 }
 0x5de   : > { %v892_v47 = vpack.c.bf16 %v1587_v46, %v1587_v46  ;;  %v860_v48 = vpop.f32.mrf.mxu2 }
 0x5e0   : > { %1483 = vmatmul.msk.bf16.vlgmr.msrb.gmra.mxu0 %vm511_vm3, %v892_v47  ;;  %v893_v49 = vunpack.c.l.bf16 %v892_v47 }
 0x5e2   : > { %v894_v50 = vsel %vm511_vm3, %v893_v49, 0.0 }
 0x5e3   : > { %895 = vadd.xlane.f32.xlu0 %v894_v50 }
 0x5e6   : > { %v973_v51 = vpop.f32.mrf.mxu2 }
 0x5e7   : > { %v977_v52 = vsel %vm511_vm3, %v973_v51, -inf }
 0x5e8   : > { %978 = vmax.xlane.f32.xlu1 %v977_v52 }
 0x5ee   : > { %v975_v53 = vpop.f32.mrf.mxu2 }
 0x5f7   : > { %1142 = vrot.lane.b32.xlu0 %v1740_v9, %s1633_s15 }
 0x5ff   : > { %1083 = vrot.lane.b32.xlu0 %v1740_v9, %s1634_s16 }
 0x601   : > { %1051 = vrot.lane.b32.xlu1 %v1740_v9, %s1635_s17 }
 0x607   : > { %1174 = vrot.lane.b32.xlu0 %v1740_v9, %s1636_s18 }
 0x609   : > { %1140 = vrot.lane.b32.xlu1 %v1740_v9, %s1637_s19 }
 0x656   : > { %v896_v60 = vpop.xlane.xlu0 %895 }
 0x657   : > { %1588 = vrcp.f32 %v896_v60  ;;  %v929_v5 = vand.u32 2147483648, %v896_v60  ;;  %v927_v7 = vand.u32 2147483647, %v896_v60  ;;  %vm923_vm11 = vweird.f32 %v896_v60 }
 0x659   : > { %v930_v10 = vor.u32 1.1754944e-38, %v929_v5  ;;  %vm928_vm13 = vcmp.eq.f32.partialorder %v927_v7, 8.507059e+37  ;;  %v479_v7 = vld [vmem:[%s1907_s3 + $0xc] sm:$0xf] }
 0x65b   : > { %v979_v61 = vpop.xlane.xlu1 %978 }
 0x65c   : > { %v980_v62 = vsub.f32 %v973_v51, %v979_v61 }
 0x65d   : > { %v1589_v63 = vpop.eup %1588  ;;  %v914_v0 = vpop.f32.mrf.mxu0 }
 0x65e   : > { %v919_v1 = vmul.f32 %v1589_v63, %v896_v60  ;;  %v981_v3 = vmul.f32 1.442695, %v980_v62  ;;  %vm924_vm10 = vweird.f32 %v1589_v63 }
 0x65f   : > { %vm925_vm12 = vmor %vm923_vm11, %vm924_vm10 }
 0x660   : > { %v920_v4 = vsub.f32 1.0, %v919_v1  ;;  %1590 = vpow2.f32 %v981_v3 }
 0x662   : > { %v921_v6 = vmul.f32 %v1589_v63, %v920_v4 }
 0x664   : > { %v922_v8 = vadd.f32 %v1589_v63, %v921_v6 }
 0x665   : > { %v916_v11 = vpop.f32.mrf.mxu0 }
 0x666   : > { %v1591_v12 = vpop.eup %1590  ;;  %v926_v13 = vsel %vm925_vm12, %v1589_v63, %v922_v8  ;;  %v1124_v8 = vsel %vm564_vm4, %v479_v7, 0  ;;  %v1212_v11 = vunpack.c.l.b16 %v479_v7 }
 0x667   : > { %v983_v14 = vpack.c.bf16 %v1591_v12, %v1591_v12  ;;  %v931_v15 = vsel %vm928_vm13, %v930_v10, %v926_v13  ;;  %1133 = vmatpush.bf16.msrb.mxu3 %v1124_v8 }
 0x668   : > { %v932_v16 = vmul.f32 %v931_v15, %v914_v0  ;;  %v1213_v13 = vpack.c.b16 %v1212_v11, %v1212_v11 }
 0x669   : > { %v1143_v17 = vpop.permute.xlu0 %1142  ;;  %1486 = vmatmul.msk.bf16.vlgmr.msra.gmra.mxu3 %vm511_vm3, %v983_v14  ;;  %v984_v18 = vunpack.c.l.bf16 %v983_v14 }
 0x66a   : > { %v933_v19 = vpack.c.bf16 %v932_v16, %v932_v16  ;;  %v1148_v20 = vsel %vm491_vm2, %v1143_v17, 0  ;;  %v1214_v15 = vrot.slane %v1213_v13, 2 }
 0x66b   : > { %1157 = vmatpush.bf16.xpose.msrb.mxu0 %v1148_v20  ;;  %v985_v21 = vsel %vm511_vm3, %v984_v18, 0.0 }
 0x66c   : > { %1484 = vmatmul.msk.bf16.vlgmr.msrb.gmra.mxu1 %vm491_vm2, %v933_v19  ;;  %986 = vadd.xlane.f32.xlu2 %v985_v21  ;;  %v1219_v18 = vsel %vm564_vm4, %v1214_v15, 0 }
 0x671   : > { %v1084_v22 = vpop.permute.xlu0 %1083 }
 0x672   : > { %v1089_v23 = vsel %vm528_vm1, %v1084_v22, 0 }
 0x673   : > { %1098 = vmatpush.bf16.msrb.mxu2 %v1089_v23  ;;  %v1052_v24 = vpop.permute.xlu1 %1051 }
 0x674   : > { %v1057_v25 = vsel %vm491_vm2, %v1052_v24, 0 }
 0x675   : > { %1066 = vmatpush.bf16.xpose.msra.mxu1 %v1057_v25 }
 0x677   : > { %1228 = vmatpush.bf16.msra.mxu2 %v1219_v18 }
 0x679   : > { %v1175_v26 = vpop.permute.xlu0 %1174 }
 0x67a   : > { %v1180_v27 = vsel %vm528_vm1, %v1175_v26, 0 }
 0x67b   : > { %v1141_v47 = vpop.permute.xlu1 %1140 }
 0x67d   : > { %1189 = vmatpush.bf16.msrb.mxu1 %v1180_v27 }
 0x684   : > { %1049 = vrot.lane.b32.xlu2 %v1740_v9, %s1638_s22 }
 0x6df   : > { %v987_v28 = vpop.xlane.xlu2 %986 }
 0x6e0   : > { %1592 = vrcp.f32 %v987_v28  ;;  %v1020_v35 = vand.u32 2147483648, %v987_v28  ;;  %v1018_v37 = vand.u32 2147483647, %v987_v28  ;;  %vm1014_vm1 = vweird.f32 %v987_v28 }
 0x6e2   : > { %v1021_v9 = vor.u32 1.1754944e-38, %v1020_v35  ;;  %vm1019_vm5 = vcmp.eq.f32.partialorder %v1018_v37, 8.507059e+37 }
 0x6e6   : > { %v1593_v29 = vpop.eup %1592 }
 0x6e7   : > { %v1010_v30 = vmul.f32 %v1593_v29, %v987_v28  ;;  %v1050_v31 = vpop.permute.xlu2 %1049  ;;  %vm1015_vm14 = vweird.f32 %v1593_v29 }
 0x6e8   : > { %1488 = vmatmul.msk.bf16.vlgmr.msra.gmra.mxu1 %vm491_vm2, %v1050_v31  ;;  %vm1016_vm15 = vmor %vm1014_vm1, %vm1015_vm14  ;;  %vm1350_vm1 = vcmask 523264  }
 0x6e9   : > { %v1011_v32 = vsub.f32 1.0, %v1010_v30  ;;  %v949_v33 = vpop.f32.mrf.mxu1 }
 0x6ea   : > { %v953_v34 = vadd.f32 %v949_v33, %v1810_v45 }
 0x6eb   : > { %v1012_v36 = vmul.f32 %v1593_v29, %v1011_v32 }
 0x6ec   : > { %v1005_v38 = vpop.f32.mrf.mxu3 }
 0x6ed   : > { %v1013_v39 = vadd.f32 %v1593_v29, %v1012_v36 }
 0x6ef   : > { %v1017_v40 = vsel %vm1016_vm15, %v1593_v29, %v1013_v39 }
 0x6f0   : > { %v1022_v41 = vsel %vm1019_vm5, %v1021_v9, %v1017_v40 }
 0x6f1   : > { %v1023_v42 = vmul.f32 %v1022_v41, %v1005_v38  ;;  %v951_v43 = vpop.f32.mrf.mxu1 }
 0x6f3   : > { %v1024_v44 = vpack.c.bf16 %v1023_v42, %v1023_v42 }
 0x6f4   : > { %v1007_v46 = vpop.f32.mrf.mxu3 }
 0x6f5   : > { %1487 = vmatmul.msk.bf16.vlgmr.msra.gmra.mxu0 %vm491_vm2, %v1024_v44 }
 0x705   : > { %1491 = vmatmul.msk.bf16.vlgmr.msrb.gmra.mxu0 %vm491_vm2, %v1141_v47 }
 0x765   : > { %v1068_v45 = vpop.f32.mrf.mxu1 }
 0x766   : > { %v1072_v48 = vsel %vm511_vm3, %v1068_v45, -inf }
 0x767   : > { %1073 = vmax.xlane.f32.xlu2 %v1072_v48 }
 0x76d   : > { %v1070_v49 = vpop.f32.mrf.mxu1 }
 0x772   : > { %v1044_v50 = vpop.f32.mrf.mxu0 }
 0x773   : > { %v1838_v51 = vadd.f32 %v1044_v50, %v953_v34 }
 0x77a   : > { %v1046_v52 = vpop.f32.mrf.mxu0 }
 0x77b   : > { %v1639_v52 = vmov 32.0  }
 0x782   : > { %v1159_v53 = vpop.f32.mrf.mxu0 }
 0x783   : > { %v1163_v54 = vsel %vm511_vm3, %v1159_v53, -inf }
 0x784   : > { %1164 = vmax.xlane.f32.xlu1 %v1163_v54 }
 0x78a   : > { %v1161_v55 = vpop.f32.mrf.mxu0 }
 0x7da   : > { %v1074_v56 = vpop.xlane.xlu2 %1073 }
 0x7db   : > { %v1075_v57 = vsub.f32 %v1068_v45, %v1074_v56 }
 0x7dd   : > { %v1076_v58 = vmul.f32 1.442695, %v1075_v57 }
 0x7df   : > { %1594 = vpow2.f32 %v1076_v58 }
 0x7e5   : > { %v1595_v59 = vpop.eup %1594 }
 0x7e6   : > { %v1078_v60 = vpack.c.bf16 %v1595_v59, %v1595_v59 }
 0x7e8   : > { %1489 = vmatmul.msk.bf16.vlgmr.msrb.gmra.mxu2 %vm511_vm3, %v1078_v60  ;;  %v1079_v61 = vunpack.c.l.bf16 %v1078_v60 }
 0x7ea   : > { %v1080_v62 = vsel %vm511_vm3, %v1079_v61, 0.0 }
 0x7eb   : > { %1081 = vadd.xlane.f32.xlu0 %v1080_v62 }
 0x7f7   : > { %v1165_v63 = vpop.xlane.xlu1 %1164 }
 0x7f8   : > { %v1166_v0 = vsub.f32 %v1159_v53, %v1165_v63  ;;  %v1524_v63 = vld [vmem:[%s1911_s7] sm:$0xff] }
 0x7fa   : > { %v1167_v1 = vmul.f32 1.442695, %v1166_v0  ;;  %v1529_v0 = vld [vmem:[%s1913_s9 + $0x18] sm:$0xff] }
 0x7fb   : > { %1358 = vmatpush.bf16.msra.mxu0 %v1529_v0 }
 0x7fc   : > { %1596 = vpow2.f32 %v1167_v1 }
 0x802   : > { %v1597_v3 = vpop.eup %1596 }
 0x803   : > { %v1169_v4 = vpack.c.bf16 %v1597_v3, %v1597_v3 }
 0x805   : > { %1492 = vmatmul.msk.bf16.vlgmr.msrb.gmra.mxu1 %vm511_vm3, %v1169_v4  ;;  %v1170_v5 = vunpack.c.l.bf16 %v1169_v4  ;;  %v1528_v4 = vld [vmem:[%s1913_s9 + $0x10] sm:$0xff] }
 0x806   : > { %1359 = vmatpush.bf16.msra.mxu0 %v1528_v4 }
 0x807   : > { %v1171_v6 = vsel %vm511_vm3, %v1170_v5, 0.0 }
 0x808   : > { %1172 = vadd.xlane.f32.xlu2 %v1171_v6  ;;  %v1527_v6 = vld [vmem:[%s1913_s9 + $0x8] sm:$0xff] }
 0x80a   : > { %1360 = vmatpush.bf16.msra.mxu0 %v1527_v6 }
 0x85e   : > { %v1082_v10 = vpop.xlane.xlu0 %1081 }
 0x85f   : > { %1598 = vrcp.f32 %v1082_v10  ;;  %v1115_v17 = vand.u32 2147483648, %v1082_v10  ;;  %v1113_v20 = vand.u32 2147483647, %v1082_v10  ;;  %vm1109_vm6 = vweird.f32 %v1082_v10 }
 0x861   : > { %v1116_v23 = vor.u32 1.1754944e-38, %v1115_v17  ;;  %vm1114_vm8 = vcmp.eq.f32.partialorder %v1113_v20, 8.507059e+37 }
 0x865   : > { %v1599_v12 = vpop.eup %1598 }
 0x866   : > { %v1105_v14 = vmul.f32 %v1599_v12, %v1082_v10  ;;  %vm1110_vm3 = vweird.f32 %v1599_v12 }
 0x867   : > { %vm1111_vm7 = vmor %vm1109_vm6, %vm1110_vm3 }
 0x868   : > { %v1106_v16 = vsub.f32 1.0, %v1105_v14  ;;  %v1564_v14 = vld [vmem:[%s1909_s5] ss:$0 sm:$0xff] }
 0x86a   : > { %v1107_v19 = vmul.f32 %v1599_v12, %v1106_v16  ;;  %v1565_v16 = vld [vmem:[%s1910_s6] ss:$0 sm:$0xff] }
 0x86b   : > { %v1100_v21 = vpop.f32.mrf.mxu2 }
 0x86c   : > { %v1108_v22 = vadd.f32 %v1599_v12, %v1107_v19 }
 0x86e   : > { %v1112_v24 = vsel %vm1111_vm7, %v1599_v12, %v1108_v22  ;;  %v1566_v22 = vld [vmem:[%s1912_s8] ss:$0 sm:$0xff] }
 0x86f   : > { %v1117_v25 = vsel %vm1114_vm8, %v1116_v23, %v1112_v24 }
 0x870   : > { %v1118_v26 = vmul.f32 %v1117_v25, %v1100_v21  ;;  %v1526_v21 = vld [vmem:[%s1913_s9] sm:$0xff] }
 0x871   : > { %1361 = vmatpush.bf16.msra.mxu0 %v1526_v21 }
 0x872   : > { %v1119_v27 = vpack.c.bf16 %v1118_v26, %v1118_v26 }
 0x873   : > { %v1102_v28 = vpop.f32.mrf.mxu2 }
 0x874   : > { %1490 = vmatmul.msk.bf16.vlgmr.msrb.gmra.mxu3 %vm491_vm2, %v1119_v27  ;;  %v1567_v28 = vld [vmem:[%s1914_s10] ss:$0 sm:$0xff] }
 0x87b   : > { %v1173_v29 = vpop.xlane.xlu2 %1172 }
 0x87c   : > { %1600 = vrcp.f32 %v1173_v29  ;;  %v1206_v34 = vand.u32 2147483648, %v1173_v29  ;;  %v1204_v36 = vand.u32 2147483647, %v1173_v29  ;;  %vm1200_vm9 = vweird.f32 %v1173_v29 }
 0x87d   : > { %1602 = vrcp.f32 %v1639_v52 }
 0x87e   : > { %v1207_v38 = vor.u32 1.1754944e-38, %v1206_v34  ;;  %vm1205_vm11 = vcmp.eq.f32.partialorder %v1204_v36, 8.507059e+37 }
 0x882   : > { %v1601_v30 = vpop.eup %1600  ;;  %v1191_v31 = vpop.f32.mrf.mxu1 }
 0x883   : > { %v1196_v32 = vmul.f32 %v1601_v30, %v1173_v29  ;;  %vm1201_vm4 = vweird.f32 %v1601_v30  ;;  %v1603_v53 = vpop.eup %1602 }
 0x884   : > { %vm1202_vm10 = vmor %vm1200_vm9, %vm1201_vm4  ;;  %v1242_v54 = vmul.f32 32.0, %v1603_v53 }
 0x885   : > { %v1197_v33 = vsub.f32 1.0, %v1196_v32 }
 0x886   : > { %v1243_v55 = vsub.f32 1.0, %v1242_v54 }
 0x887   : > { %v1198_v35 = vmul.f32 %v1601_v30, %v1197_v33 }
 0x888   : > { %v1244_v56 = vmul.f32 %v1603_v53, %v1243_v55 }
 0x889   : > { %v1199_v37 = vadd.f32 %v1601_v30, %v1198_v35 }
 0x88a   : > { %v1193_v39 = vpop.f32.mrf.mxu1  ;;  %v1245_v57 = vadd.f32 %v1603_v53, %v1244_v56 }
 0x88b   : > { %v1203_v9 = vsel %vm1202_vm10, %v1601_v30, %v1199_v37 }
 0x88c   : > { %v1208_v40 = vsel %vm1205_vm11, %v1207_v38, %v1203_v9 }
 0x88d   : > { %v1209_v41 = vmul.f32 %v1208_v40, %v1191_v31 }
 0x88f   : > { %v1210_v42 = vpack.c.bf16 %v1209_v41, %v1209_v41 }
 0x891   : > { %1493 = vmatmul.msk.bf16.vlgmr.msra.gmra.mxu2 %vm491_vm2, %v1210_v42  ;;  %vm1246_vm2 = vweird.f32 %v1603_v53 }
 0x892   : > { %v1247_v58 = vsel %vm1246_vm2, %v1603_v53, %v1245_v57 }
 0x8f7   : > { %v1135_v43 = vpop.f32.mrf.mxu3 }
 0x8f8   : > { %v1139_v46 = vadd.f32 %v1135_v43, %v1838_v51 }
 0x8ff   : > { %v1137_v44 = vpop.f32.mrf.mxu3 }
 0x914   : > { %v1230_v47 = vpop.f32.mrf.mxu2 }
 0x915   : > { %v1234_v45 = vadd.f32 %v1230_v47, %v1139_v46 }
 0x917   : > { %v1235_v48 = vadd.f32 %v1234_v45, %v1732_v2  ;;  %v1525_v2 = vld [vmem:[%s1911_s7 + $0x8] sm:$0xff]  ;;  %v1568_v45 = vld [vmem:[%s1915_s11] ss:$0 sm:$0xff] }
 0x918   : > { %1305 = vmatpush.bf16.msra.mxu3 %v1525_v2 }
 0x919   : > { %v1238_v49 = vsel %vm459_vm0, %v1235_v48, 0.0 }
 0x91a   : > { %1239 = vadd.xlane.f32.xlu1 %v1238_v49  ;;  %v1569_v49 = vld [vmem:[%s1916_s12] ss:$0 sm:$0xff] }
 0x91c   : > { %v1232_v50 = vpop.f32.mrf.mxu2  ;;  %1306 = vmatpush.bf16.msra.mxu3 %v1524_v63 }
 0x98d   : > { %v1240_v59 = vpop.xlane.xlu1 %1239 }
 0x98e   : > { %v1248_v60 = vmul.f32 %v1247_v58, %v1240_v59 }
 0x990   : > { %v1249_v51 = vsub.f32 %v1235_v48, %v1248_v60 }
 0x992   : > { %v1250_v61 = vmul.f32 %v1249_v51, %v1249_v51 }
 0x994   : > { %v1251_v62 = vsel %vm459_vm0, %v1250_v61, 0.0 }
 0x995   : > { %1252 = vadd.xlane.f32.xlu2 %v1251_v62 }
 0xa08   : > { %v1253_v1 = vpop.xlane.xlu2 %1252 }
 0xa09   : > { %v1254_v3 = vmul.f32 %v1253_v1, %v1247_v58 }
 0xa0b   : > { %v1255_v5 = vadd.f32 1e-05, %v1254_v3 }
 0xa0d   : > { %1604 = vrsqrt.f32 %v1255_v5  ;;  %vm1262_vm13 = vweird.f32 %v1255_v5 }
 0xa13   : > { %v1605_v7 = vpop.eup %1604 }
 0xa14   : > { %v1257_v8 = vmul.f32 %v1605_v7, %v1255_v5  ;;  %vm1263_vm12 = vweird.f32 %v1605_v7 }
 0xa15   : > { %vm1264_vm14 = vmor %vm1262_vm13, %vm1263_vm12 }
 0xa16   : > { %v1258_v10 = vmul.f32 %v1605_v7, %v1257_v8 }
 0xa18   : > { %v1259_v11 = vmul.f32 0.5, %v1258_v10 }
 0xa1a   : > { %v1260_v12 = vsub.f32 1.5, %v1259_v11 }
 0xa1c   : > { %v1261_v13 = vmul.f32 %v1605_v7, %v1260_v12 }
 0xa1e   : > { %v1265_v15 = vsel %vm1264_vm14, %v1605_v7, %v1261_v13 }
 0xa1f   : > { %v1266_v17 = vmul.f32 %v1265_v15, %v1249_v51 }
 0xa21   : > { %v1270_v18 = vmul.f32 %v1564_v14, %v1266_v17 }
 0xa23   : > { %v1274_v19 = vadd.f32 %v1565_v16, %v1270_v18 }
 0xa25   : > { %v1275_v20 = vpack.c.bf16 %v1274_v19, %v1274_v19 }
 0xa27   : > { %1502 = vmatmul.msk.bf16.vlgmr.msra.gmra.mxu3 %vm459_vm0, %v1275_v20 }
 0xaaa   : > { %v1308_v23 = vpop.f32.mrf.mxu3 }
 0xaab   : > { %v1309_v24 = vadd.f32 %v1566_v22, %v1308_v23 }
 0xaad   : > { %v1312_v25 = vmax.f32 %v1309_v24, 0.0 }
 0xaaf   : > { %v1313_v26 = vpack.c.bf16 %v1312_v25, %v1312_v25 }
 0xab1   : > { %1519 = vmatmul.msk.bf16.vlgmr.msra.gmra.mxu0 %vm1350_vm1, %v1313_v26 }
 0xab2   : > { %v1310_v27 = vpop.f32.mrf.mxu3 }
 0xb2e   : > { %v1363_v29 = vpop.f32.mrf.mxu0 }
 0xb2f   : > { %v1364_v30 = vadd.f32 %v1567_v28, %v1363_v29 }
 0xb31   : > { %v1367_v31 = vadd.f32 %v1364_v30, %v1274_v19 }
 0xb33   : > { %v1370_v32 = vsel %vm459_vm0, %v1367_v31, 0.0 }
 0xb34   : > { %1371 = vadd.xlane.f32.xlu1 %v1370_v32 }
 0xb36   : > { %v1365_v33 = vpop.f32.mrf.mxu0 }
 0xba7   : > { %v1372_v34 = vpop.xlane.xlu1 %1371 }
 0xba8   : > { %v1373_v35 = vmul.f32 %v1372_v34, %v1247_v58 }
 0xbaa   : > { %v1374_v36 = vsub.f32 %v1367_v31, %v1373_v35 }
 0xbac   : > { %v1375_v37 = vmul.f32 %v1374_v36, %v1374_v36 }
 0xbae   : > { %v1376_v38 = vsel %vm459_vm0, %v1375_v37, 0.0 }
 0xbaf   : > { %1377 = vadd.xlane.f32.xlu2 %v1376_v38 }
 0xc22   : > { %v1378_v39 = vpop.xlane.xlu2 %1377 }
 0xc23   : > { %v1379_v9 = vmul.f32 %v1378_v39, %v1247_v58 }
 0xc25   : > { %v1380_v40 = vadd.f32 1e-05, %v1379_v9 }
 0xc27   : > { %1606 = vrsqrt.f32 %v1380_v40  ;;  %vm1387_vm5 = vweird.f32 %v1380_v40 }
 0xc2d   : > { %v1607_v41 = vpop.eup %1606 }
 0xc2e   : > { %v1382_v42 = vmul.f32 %v1607_v41, %v1380_v40  ;;  %vm1388_vm15 = vweird.f32 %v1607_v41 }
 0xc2f   : > { %vm1389_vm3 = vmor %vm1387_vm5, %vm1388_vm15 }
 0xc30   : > { %v1383_v43 = vmul.f32 %v1607_v41, %v1382_v42 }
 0xc32   : > { %v1384_v44 = vmul.f32 0.5, %v1383_v43 }
 0xc34   : > { %v1385_v46 = vsub.f32 1.5, %v1384_v44 }
 0xc36   : > { %v1386_v47 = vmul.f32 %v1607_v41, %v1385_v46 }
 0xc38   : > { %v1390_v48 = vsel %vm1389_vm3, %v1607_v41, %v1386_v47 }
 0xc39   : > { %v1391_v50 = vmul.f32 %v1390_v48, %v1374_v36 }
 0xc3b   : > { %v1395_v52 = vmul.f32 %v1568_v45, %v1391_v50 }
 0xc3d   : > { %v1399_v53 = vadd.f32 %v1569_v49, %v1395_v52 }
 0xc3f   : > { %1400 = vst.msk [vmem:[%s435_s23] sm:$0xff] %vm459_vm0, %v1399_v53 }
 0xc40 PF: > { %s23_s25 = sadd.s32 1, %s1614_s25  }
 0xc41   : > { %p20_p4 = scmp.ge.s32.totalorder %s23_s25, 4  }
 0xc43   :  { %22 = sbr.rel (!%p20_p4) target bundleno = 1 (0x1), region = 102 }

</bundles_post_ra>
